<compile_context>
chip_gen: v5e
topology: v5e:2x2
jax: 0.10.0
libtpu: 0.0.40
codegen_flags: <defaults>
</compile_context>

<pallas_src>
import numpy as np
import jax
import jax.numpy as jnp
from jax import lax
from jax.experimental import pallas as pl
from jax.experimental.pallas import tpu as pltpu

LANE = 128            # lane axis width (last dim of every block)
CHUNK_ROWS = 64       # inner row chunk: 8 f32 vregs per temporary -> no spills
MAX_TILE_ROWS = 2048  # per-grid-step block: 1 MiB conf + 0.5 MiB acc (x2 bufs)
MIN_GRID_TILES = 2    # keep both v7x TensorCores busy when there is enough work


def _cdiv(a, b):
    return -(-a // b)


def _round_up(a, b):
    return _cdiv(a, b) * b


def _make_ece_kernel(n_bins: int, tile_rows: int, chunk: int):
    # Static bin boundaries, matching torch.linspace(0, 1, n_bins + 1) (f32).
    boundaries = np.linspace(0.0, 1.0, n_bins + 1, dtype=np.float32)
    nb1 = n_bins + 1
    num_chunks = tile_rows // chunk

    def ece_kernel(conf_ref, acc_ref, out_ref):
        # conf block: (tile_rows, 128) f32, padding = -1.0 (never > boundary 0)
        # acc  block: (tile_rows, 128) bf16 in {0, 1}, padding = 0
        # out  block: (3 * (n_bins + 1), 128) f32 per-boundary, per-lane sums.
        def body(ci, carry):
            start = pl.multiple_of(ci * chunk, chunk)
            conf = conf_ref[pl.ds(start, chunk), :]
            acc = acc_ref[pl.ds(start, chunk), :].astype(jnp.float32)
            s_rows, t_rows, u_rows = [], [], []
            # One compare per *boundary* (not two per bin); per-bin partials
            # are recovered as neighbouring differences in the epilogue, which
            # preserves the exact (lo, hi] compare semantics of the reference.
            for b in range(nb1):
                cf = (conf > float(boundaries[b])).astype(jnp.float32)
                s_rows.append(jnp.sum(cf, axis=0, keepdims=True))
                t_rows.append(jnp.sum(cf * conf, axis=0, keepdims=True))
                u_rows.append(jnp.sum(cf * acc, axis=0, keepdims=True))
            partial = jnp.concatenate(s_rows + t_rows + u_rows, axis=0)
            return carry + partial

        init = jnp.zeros((3 * nb1, LANE), jnp.float32)
        totals = lax.fori_loop(0, num_chunks, body, init)
        out_ref[...] = totals  # single lane-dense full-block store per tile

    return ece_kernel


def ece_loss(confidences, predictions, labels, n_bins: int = 15):
    """Pallas implementation of _ECELoss.forward (returns shape (1,) float32).

    confidences: f32[N] in [0, 1]; predictions, labels: integer [N].
    """
    # TODO(synk): the plotting-only accuracy_in_bin_list / matplotlib branch of
    # the PyTorch module is not reproduced (it does not affect the return value).
    n = int(confidences.shape[0])
    if n == 0:
        # torch: prop_in_bin is nan, `nan > 0` is False -> ece stays 0.
        return jnp.zeros((1,), jnp.float32)

    rows = _cdiv(n, LANE)
    num_tiles = max(1, _cdiv(rows, MAX_TILE_ROWS))
    if rows >= 2 * CHUNK_ROWS:
        num_tiles = max(num_tiles, MIN_GRID_TILES)  # v7x: shard over both TCs
    tile_rows = _round_up(_cdiv(rows, num_tiles), CHUNK_ROWS)
    rows_padded = num_tiles * tile_rows
    n_pad = rows_padded * LANE

    # Accuracy is computed once here (bf16 {0,1}); the kernel never sees the
    # int32 prediction/label streams -> ~half the kernel HBM traffic.
    conf = jnp.full((n_pad,), -1.0, jnp.float32).at[:n].set(
        confidences.astype(jnp.float32))
    acc = (predictions.astype(jnp.int32) == labels.astype(jnp.int32)
           ).astype(jnp.bfloat16)
    acc_p = jnp.zeros((n_pad,), jnp.bfloat16).at[:n].set(acc)

    conf2d = conf.reshape(rows_padded, LANE)
    acc2d = acc_p.reshape(rows_padded, LANE)

    nb1 = n_bins + 1
    kernel = _make_ece_kernel(n_bins, tile_rows, CHUNK_ROWS)

    partials = pl.pallas_call(
        kernel,
        out_shape=jax.ShapeDtypeStruct((num_tiles, 3 * nb1, LANE), jnp.float32),
        grid=(num_tiles,),
        in_specs=[
            pl.BlockSpec((tile_rows, LANE), lambda i: (i, 0)),
            pl.BlockSpec((tile_rows, LANE), lambda i: (i, 0)),
        ],
        out_specs=pl.BlockSpec((None, 3 * nb1, LANE), lambda i: (i, 0, 0)),
        compiler_params=pltpu.CompilerParams(
            dimension_semantics=("parallel",),
            vmem_limit_bytes=32 * 1024 * 1024,
        ),
    )(conf2d, acc2d)

    # Tiny epilogue: combine tile/lane partials, turn per-boundary sums into
    # per-bin sums via neighbouring differences, then the per-bin scalar math.
    sums = partials.sum(axis=0)                        # (3*(n_bins+1), 128)
    per_b = sums.reshape(3, nb1, LANE).sum(axis=-1)    # (3, n_bins+1)
    s_b, t_b, u_b = per_b[0], per_b[1], per_b[2]
    cnt = s_b[:-1] - s_b[1:]          # elements per bin (exact integers)
    sum_conf = t_b[:-1] - t_b[1:]     # sum of confidences per bin
    sum_acc = u_b[:-1] - u_b[1:]      # sum of accuracies per bin
    nonzero = cnt > 0
    safe_cnt = jnp.maximum(cnt, 1.0)
    prop_in_bin = cnt / jnp.float32(n)  # mean over the real N samples
    avg_conf = sum_conf / safe_cnt
    avg_acc = sum_acc / safe_cnt
    ece = jnp.sum(
        jnp.where(nonzero, jnp.abs(avg_conf - avg_acc) * prop_in_bin, 0.0))
    return ece.reshape(1)  # same shape as the torch module's `ece`


def _reference_ece(confidences, predictions, labels, n_bins: int = 15):
    """Pure-numpy replica of the PyTorch forward for verification."""
    conf = np.asarray(confidences, np.float32)
    acc = (np.asarray(predictions) == np.asarray(labels)).astype(np.float32)
    bounds = np.linspace(0.0, 1.0, n_bins + 1, dtype=np.float32)
    ece = np.zeros(1, np.float32)
    for lo, hi in zip(bounds[:-1], bounds[1:]):
        in_bin = (conf > lo) & (conf <= hi)
        prop = in_bin.astype(np.float32).mean()
        if prop > 0:
            acc_in = acc[in_bin].mean()
            conf_in = conf[in_bin].mean()
            ece += np.abs(conf_in - acc_in) * prop
    return ece


if __name__ == "__main__":
    key = jax.random.PRNGKey(0)
    NUM_CLASSES = 10

    # Small case: single tile, single inner chunk.
    N = 1024
    k1, k2, k3, k4, k5, k6 = jax.random.split(key, 6)
    confidences = jax.random.uniform(k1, (N,), jnp.float32)
    predictions = jax.random.randint(k2, (N,), 0, NUM_CLASSES, jnp.int32)
    labels = jax.random.randint(k3, (N,), 0, NUM_CLASSES, jnp.int32)

    ece = ece_loss(confidences, predictions, labels, n_bins=15)
    ece = jax.block_until_ready(ece)
    ref = _reference_ece(
        np.asarray(confidences), np.asarray(predictions), np.asarray(labels))
    assert ece.shape == (1,)
    np.testing.assert_allclose(np.asarray(ece), ref, rtol=1e-4, atol=1e-5)

    # Multi-tile case: exercises the grid (2 tiles), the inner chunk loop,
    # pipelining and the inert padding.
    N2 = 70000
    confidences2 = jax.random.uniform(k4, (N2,), jnp.float32)
    predictions2 = jax.random.randint(k5, (N2,), 0, NUM_CLASSES, jnp.int32)
    labels2 = jax.random.randint(k6, (N2,), 0, NUM_CLASSES, jnp.int32)

    ece2 = ece_loss(confidences2, predictions2, labels2, n_bins=15)
    ece2 = jax.block_until_ready(ece2)
    ref2 = _reference_ece(
        np.asarray(confidences2), np.asarray(predictions2), np.asarray(labels2))
    np.testing.assert_allclose(np.asarray(ece2), ref2, rtol=1e-4, atol=1e-5)

    print("KERNEL_OK")
</pallas_src>

<mosaic_0001>
module attributes {stable_mosaic.version = 11 : i64} {
  func.func @ece_kernel(%arg0: i32, %arg1: memref<64x128xf32, #tpu.memory_space<vmem>>, %arg2: memref<64x128xbf16, #tpu.memory_space<vmem>>, %arg3: memref<1x48x128xf32, #tpu.memory_space<vmem>>) attributes {dimension_semantics = [#tpu.dimension_semantics<parallel>], iteration_bounds = array<i64: 1>, scalar_prefetch = 0 : i64, scratch_operands = 0 : i64, tpu.core_type = #tpu.core_type<tc>, window_params = [{transform_indices = @transform_0, window_bounds = array<i64: 64, 128>}, {transform_indices = @transform_1, window_bounds = array<i64: 64, 128>}, {transform_indices = @transform_2, window_bounds = array<i64: 1, 48, 128>}]} {
    %cst = arith.constant 0.000000e+00 : f32
    %0 = vector.broadcast %cst : f32 to vector<48x128xf32>
    %c0_i32 = arith.constant 0 : i32
    %c64_i32 = arith.constant 64 : i32
    %1 = arith.muli %c0_i32, %c64_i32 : i32
    %2 = tpu.assume_multiple %1, 64 : i32
    %3 = arith.index_cast %2 : i32 to index
    %c0 = arith.constant 0 : index
    %4 = vector.load %arg1[%3, %c0] : memref<64x128xf32, #tpu.memory_space<vmem>>, vector<64x128xf32>
    %5 = arith.index_cast %2 : i32 to index
    %c0_0 = arith.constant 0 : index
    %6 = vector.load %arg2[%5, %c0_0] : memref<64x128xbf16, #tpu.memory_space<vmem>>, vector<64x128xbf16>
    %7 = arith.extf %6 : vector<64x128xbf16> to vector<64x128xf32>
    %cst_1 = arith.constant 0.000000e+00 : f32
    %8 = vector.broadcast %cst_1 : f32 to vector<64x128xf32>
    %9 = arith.cmpf ogt, %4, %8 : vector<64x128xf32>
    %10 = arith.extui %9 : vector<64x128xi1> to vector<64x128xi32>
    %11 = arith.sitofp %10 : vector<64x128xi32> to vector<64x128xf32>
    %cst_2 = arith.constant dense<0.000000e+00> : vector<128xf32>
    %12 = vector.multi_reduction <add>, %11, %cst_2 [0] : vector<64x128xf32> to vector<128xf32>
    %13 = vector.shape_cast %12 : vector<128xf32> to vector<1x128xf32>
    %14 = arith.mulf %11, %4 : vector<64x128xf32>
    %cst_3 = arith.constant dense<0.000000e+00> : vector<128xf32>
    %15 = vector.multi_reduction <add>, %14, %cst_3 [0] : vector<64x128xf32> to vector<128xf32>
    %16 = vector.shape_cast %15 : vector<128xf32> to vector<1x128xf32>
    %17 = arith.mulf %11, %7 : vector<64x128xf32>
    %cst_4 = arith.constant dense<0.000000e+00> : vector<128xf32>
    %18 = vector.multi_reduction <add>, %17, %cst_4 [0] : vector<64x128xf32> to vector<128xf32>
    %19 = vector.shape_cast %18 : vector<128xf32> to vector<1x128xf32>
    %cst_5 = arith.constant 0.0666666701 : f32
    %20 = vector.broadcast %cst_5 : f32 to vector<64x128xf32>
    %21 = arith.cmpf ogt, %4, %20 : vector<64x128xf32>
    %22 = arith.extui %21 : vector<64x128xi1> to vector<64x128xi32>
    %23 = arith.sitofp %22 : vector<64x128xi32> to vector<64x128xf32>
    %cst_6 = arith.constant dense<0.000000e+00> : vector<128xf32>
    %24 = vector.multi_reduction <add>, %23, %cst_6 [0] : vector<64x128xf32> to vector<128xf32>
    %25 = vector.shape_cast %24 : vector<128xf32> to vector<1x128xf32>
    %26 = arith.mulf %23, %4 : vector<64x128xf32>
    %cst_7 = arith.constant dense<0.000000e+00> : vector<128xf32>
    %27 = vector.multi_reduction <add>, %26, %cst_7 [0] : vector<64x128xf32> to vector<128xf32>
    %28 = vector.shape_cast %27 : vector<128xf32> to vector<1x128xf32>
    %29 = arith.mulf %23, %7 : vector<64x128xf32>
    %cst_8 = arith.constant dense<0.000000e+00> : vector<128xf32>
    %30 = vector.multi_reduction <add>, %29, %cst_8 [0] : vector<64x128xf32> to vector<128xf32>
    %31 = vector.shape_cast %30 : vector<128xf32> to vector<1x128xf32>
    %cst_9 = arith.constant 0.13333334 : f32
    %32 = vector.broadcast %cst_9 : f32 to vector<64x128xf32>
    %33 = arith.cmpf ogt, %4, %32 : vector<64x128xf32>
    %34 = arith.extui %33 : vector<64x128xi1> to vector<64x128xi32>
    %35 = arith.sitofp %34 : vector<64x128xi32> to vector<64x128xf32>
    %cst_10 = arith.constant dense<0.000000e+00> : vector<128xf32>
    %36 = vector.multi_reduction <add>, %35, %cst_10 [0] : vector<64x128xf32> to vector<128xf32>
    %37 = vector.shape_cast %36 : vector<128xf32> to vector<1x128xf32>
    %38 = arith.mulf %35, %4 : vector<64x128xf32>
    %cst_11 = arith.constant dense<0.000000e+00> : vector<128xf32>
    %39 = vector.multi_reduction <add>, %38, %cst_11 [0] : vector<64x128xf32> to vector<128xf32>
    %40 = vector.shape_cast %39 : vector<128xf32> to vector<1x128xf32>
    %41 = arith.mulf %35, %7 : vector<64x128xf32>
    %cst_12 = arith.constant dense<0.000000e+00> : vector<128xf32>
    %42 = vector.multi_reduction <add>, %41, %cst_12 [0] : vector<64x128xf32> to vector<128xf32>
    %43 = vector.shape_cast %42 : vector<128xf32> to vector<1x128xf32>
    %cst_13 = arith.constant 2.000000e-01 : f32
    %44 = vector.broadcast %cst_13 : f32 to vector<64x128xf32>
    %45 = arith.cmpf ogt, %4, %44 : vector<64x128xf32>
    %46 = arith.extui %45 : vector<64x128xi1> to vector<64x128xi32>
    %47 = arith.sitofp %46 : vector<64x128xi32> to vector<64x128xf32>
    %cst_14 = arith.constant dense<0.000000e+00> : vector<128xf32>
    %48 = vector.multi_reduction <add>, %47, %cst_14 [0] : vector<64x128xf32> to vector<128xf32>
    %49 = vector.shape_cast %48 : vector<128xf32> to vector<1x128xf32>
    %50 = arith.mulf %47, %4 : vector<64x128xf32>
    %cst_15 = arith.constant dense<0.000000e+00> : vector<128xf32>
    %51 = vector.multi_reduction <add>, %50, %cst_15 [0] : vector<64x128xf32> to vector<128xf32>
    %52 = vector.shape_cast %51 : vector<128xf32> to vector<1x128xf32>
    %53 = arith.mulf %47, %7 : vector<64x128xf32>
    %cst_16 = arith.constant dense<0.000000e+00> : vector<128xf32>
    %54 = vector.multi_reduction <add>, %53, %cst_16 [0] : vector<64x128xf32> to vector<128xf32>
    %55 = vector.shape_cast %54 : vector<128xf32> to vector<1x128xf32>
    %cst_17 = arith.constant 0.266666681 : f32
    %56 = vector.broadcast %cst_17 : f32 to vector<64x128xf32>
    %57 = arith.cmpf ogt, %4, %56 : vector<64x128xf32>
    %58 = arith.extui %57 : vector<64x128xi1> to vector<64x128xi32>
    %59 = arith.sitofp %58 : vector<64x128xi32> to vector<64x128xf32>
    %cst_18 = arith.constant dense<0.000000e+00> : vector<128xf32>
    %60 = vector.multi_reduction <add>, %59, %cst_18 [0] : vector<64x128xf32> to vector<128xf32>
    %61 = vector.shape_cast %60 : vector<128xf32> to vector<1x128xf32>
    %62 = arith.mulf %59, %4 : vector<64x128xf32>
    %cst_19 = arith.constant dense<0.000000e+00> : vector<128xf32>
    %63 = vector.multi_reduction <add>, %62, %cst_19 [0] : vector<64x128xf32> to vector<128xf32>
    %64 = vector.shape_cast %63 : vector<128xf32> to vector<1x128xf32>
    %65 = arith.mulf %59, %7 : vector<64x128xf32>
    %cst_20 = arith.constant dense<0.000000e+00> : vector<128xf32>
    %66 = vector.multi_reduction <add>, %65, %cst_20 [0] : vector<64x128xf32> to vector<128xf32>
    %67 = vector.shape_cast %66 : vector<128xf32> to vector<1x128xf32>
    %cst_21 = arith.constant 0.333333343 : f32
    %68 = vector.broadcast %cst_21 : f32 to vector<64x128xf32>
    %69 = arith.cmpf ogt, %4, %68 : vector<64x128xf32>
    %70 = arith.extui %69 : vector<64x128xi1> to vector<64x128xi32>
    %71 = arith.sitofp %70 : vector<64x128xi32> to vector<64x128xf32>
    %cst_22 = arith.constant dense<0.000000e+00> : vector<128xf32>
    %72 = vector.multi_reduction <add>, %71, %cst_22 [0] : vector<64x128xf32> to vector<128xf32>
    %73 = vector.shape_cast %72 : vector<128xf32> to vector<1x128xf32>
    %74 = arith.mulf %71, %4 : vector<64x128xf32>
    %cst_23 = arith.constant dense<0.000000e+00> : vector<128xf32>
    %75 = vector.multi_reduction <add>, %74, %cst_23 [0] : vector<64x128xf32> to vector<128xf32>
    %76 = vector.shape_cast %75 : vector<128xf32> to vector<1x128xf32>
    %77 = arith.mulf %71, %7 : vector<64x128xf32>
    %cst_24 = arith.constant dense<0.000000e+00> : vector<128xf32>
    %78 = vector.multi_reduction <add>, %77, %cst_24 [0] : vector<64x128xf32> to vector<128xf32>
    %79 = vector.shape_cast %78 : vector<128xf32> to vector<1x128xf32>
    %cst_25 = arith.constant 4.000000e-01 : f32
    %80 = vector.broadcast %cst_25 : f32 to vector<64x128xf32>
    %81 = arith.cmpf ogt, %4, %80 : vector<64x128xf32>
    %82 = arith.extui %81 : vector<64x128xi1> to vector<64x128xi32>
    %83 = arith.sitofp %82 : vector<64x128xi32> to vector<64x128xf32>
    %cst_26 = arith.constant dense<0.000000e+00> : vector<128xf32>
    %84 = vector.multi_reduction <add>, %83, %cst_26 [0] : vector<64x128xf32> to vector<128xf32>
    %85 = vector.shape_cast %84 : vector<128xf32> to vector<1x128xf32>
    %86 = arith.mulf %83, %4 : vector<64x128xf32>
    %cst_27 = arith.constant dense<0.000000e+00> : vector<128xf32>
    %87 = vector.multi_reduction <add>, %86, %cst_27 [0] : vector<64x128xf32> to vector<128xf32>
    %88 = vector.shape_cast %87 : vector<128xf32> to vector<1x128xf32>
    %89 = arith.mulf %83, %7 : vector<64x128xf32>
    %cst_28 = arith.constant dense<0.000000e+00> : vector<128xf32>
    %90 = vector.multi_reduction <add>, %89, %cst_28 [0] : vector<64x128xf32> to vector<128xf32>
    %91 = vector.shape_cast %90 : vector<128xf32> to vector<1x128xf32>
    %cst_29 = arith.constant 0.466666669 : f32
    %92 = vector.broadcast %cst_29 : f32 to vector<64x128xf32>
    %93 = arith.cmpf ogt, %4, %92 : vector<64x128xf32>
    %94 = arith.extui %93 : vector<64x128xi1> to vector<64x128xi32>
    %95 = arith.sitofp %94 : vector<64x128xi32> to vector<64x128xf32>
    %cst_30 = arith.constant dense<0.000000e+00> : vector<128xf32>
    %96 = vector.multi_reduction <add>, %95, %cst_30 [0] : vector<64x128xf32> to vector<128xf32>
    %97 = vector.shape_cast %96 : vector<128xf32> to vector<1x128xf32>
    %98 = arith.mulf %95, %4 : vector<64x128xf32>
    %cst_31 = arith.constant dense<0.000000e+00> : vector<128xf32>
    %99 = vector.multi_reduction <add>, %98, %cst_31 [0] : vector<64x128xf32> to vector<128xf32>
    %100 = vector.shape_cast %99 : vector<128xf32> to vector<1x128xf32>
    %101 = arith.mulf %95, %7 : vector<64x128xf32>
    %cst_32 = arith.constant dense<0.000000e+00> : vector<128xf32>
    %102 = vector.multi_reduction <add>, %101, %cst_32 [0] : vector<64x128xf32> to vector<128xf32>
    %103 = vector.shape_cast %102 : vector<128xf32> to vector<1x128xf32>
    %cst_33 = arith.constant 0.533333361 : f32
    %104 = vector.broadcast %cst_33 : f32 to vector<64x128xf32>
    %105 = arith.cmpf ogt, %4, %104 : vector<64x128xf32>
    %106 = arith.extui %105 : vector<64x128xi1> to vector<64x128xi32>
    %107 = arith.sitofp %106 : vector<64x128xi32> to vector<64x128xf32>
    %cst_34 = arith.constant dense<0.000000e+00> : vector<128xf32>
    %108 = vector.multi_reduction <add>, %107, %cst_34 [0] : vector<64x128xf32> to vector<128xf32>
    %109 = vector.shape_cast %108 : vector<128xf32> to vector<1x128xf32>
    %110 = arith.mulf %107, %4 : vector<64x128xf32>
    %cst_35 = arith.constant dense<0.000000e+00> : vector<128xf32>
    %111 = vector.multi_reduction <add>, %110, %cst_35 [0] : vector<64x128xf32> to vector<128xf32>
    %112 = vector.shape_cast %111 : vector<128xf32> to vector<1x128xf32>
    %113 = arith.mulf %107, %7 : vector<64x128xf32>
    %cst_36 = arith.constant dense<0.000000e+00> : vector<128xf32>
    %114 = vector.multi_reduction <add>, %113, %cst_36 [0] : vector<64x128xf32> to vector<128xf32>
    %115 = vector.shape_cast %114 : vector<128xf32> to vector<1x128xf32>
    %cst_37 = arith.constant 6.000000e-01 : f32
    %116 = vector.broadcast %cst_37 : f32 to vector<64x128xf32>
    %117 = arith.cmpf ogt, %4, %116 : vector<64x128xf32>
    %118 = arith.extui %117 : vector<64x128xi1> to vector<64x128xi32>
    %119 = arith.sitofp %118 : vector<64x128xi32> to vector<64x128xf32>
    %cst_38 = arith.constant dense<0.000000e+00> : vector<128xf32>
    %120 = vector.multi_reduction <add>, %119, %cst_38 [0] : vector<64x128xf32> to vector<128xf32>
    %121 = vector.shape_cast %120 : vector<128xf32> to vector<1x128xf32>
    %122 = arith.mulf %119, %4 : vector<64x128xf32>
    %cst_39 = arith.constant dense<0.000000e+00> : vector<128xf32>
    %123 = vector.multi_reduction <add>, %122, %cst_39 [0] : vector<64x128xf32> to vector<128xf32>
    %124 = vector.shape_cast %123 : vector<128xf32> to vector<1x128xf32>
    %125 = arith.mulf %119, %7 : vector<64x128xf32>
    %cst_40 = arith.constant dense<0.000000e+00> : vector<128xf32>
    %126 = vector.multi_reduction <add>, %125, %cst_40 [0] : vector<64x128xf32> to vector<128xf32>
    %127 = vector.shape_cast %126 : vector<128xf32> to vector<1x128xf32>
    %cst_41 = arith.constant 0.666666686 : f32
    %128 = vector.broadcast %cst_41 : f32 to vector<64x128xf32>
    %129 = arith.cmpf ogt, %4, %128 : vector<64x128xf32>
    %130 = arith.extui %129 : vector<64x128xi1> to vector<64x128xi32>
    %131 = arith.sitofp %130 : vector<64x128xi32> to vector<64x128xf32>
    %cst_42 = arith.constant dense<0.000000e+00> : vector<128xf32>
    %132 = vector.multi_reduction <add>, %131, %cst_42 [0] : vector<64x128xf32> to vector<128xf32>
    %133 = vector.shape_cast %132 : vector<128xf32> to vector<1x128xf32>
    %134 = arith.mulf %131, %4 : vector<64x128xf32>
    %cst_43 = arith.constant dense<0.000000e+00> : vector<128xf32>
    %135 = vector.multi_reduction <add>, %134, %cst_43 [0] : vector<64x128xf32> to vector<128xf32>
    %136 = vector.shape_cast %135 : vector<128xf32> to vector<1x128xf32>
    %137 = arith.mulf %131, %7 : vector<64x128xf32>
    %cst_44 = arith.constant dense<0.000000e+00> : vector<128xf32>
    %138 = vector.multi_reduction <add>, %137, %cst_44 [0] : vector<64x128xf32> to vector<128xf32>
    %139 = vector.shape_cast %138 : vector<128xf32> to vector<1x128xf32>
    %cst_45 = arith.constant 0.733333349 : f32
    %140 = vector.broadcast %cst_45 : f32 to vector<64x128xf32>
    %141 = arith.cmpf ogt, %4, %140 : vector<64x128xf32>
    %142 = arith.extui %141 : vector<64x128xi1> to vector<64x128xi32>
    %143 = arith.sitofp %142 : vector<64x128xi32> to vector<64x128xf32>
    %cst_46 = arith.constant dense<0.000000e+00> : vector<128xf32>
    %144 = vector.multi_reduction <add>, %143, %cst_46 [0] : vector<64x128xf32> to vector<128xf32>
    %145 = vector.shape_cast %144 : vector<128xf32> to vector<1x128xf32>
    %146 = arith.mulf %143, %4 : vector<64x128xf32>
    %cst_47 = arith.constant dense<0.000000e+00> : vector<128xf32>
    %147 = vector.multi_reduction <add>, %146, %cst_47 [0] : vector<64x128xf32> to vector<128xf32>
    %148 = vector.shape_cast %147 : vector<128xf32> to vector<1x128xf32>
    %149 = arith.mulf %143, %7 : vector<64x128xf32>
    %cst_48 = arith.constant dense<0.000000e+00> : vector<128xf32>
    %150 = vector.multi_reduction <add>, %149, %cst_48 [0] : vector<64x128xf32> to vector<128xf32>
    %151 = vector.shape_cast %150 : vector<128xf32> to vector<1x128xf32>
    %cst_49 = arith.constant 8.000000e-01 : f32
    %152 = vector.broadcast %cst_49 : f32 to vector<64x128xf32>
    %153 = arith.cmpf ogt, %4, %152 : vector<64x128xf32>
    %154 = arith.extui %153 : vector<64x128xi1> to vector<64x128xi32>
    %155 = arith.sitofp %154 : vector<64x128xi32> to vector<64x128xf32>
    %cst_50 = arith.constant dense<0.000000e+00> : vector<128xf32>
    %156 = vector.multi_reduction <add>, %155, %cst_50 [0] : vector<64x128xf32> to vector<128xf32>
    %157 = vector.shape_cast %156 : vector<128xf32> to vector<1x128xf32>
    %158 = arith.mulf %155, %4 : vector<64x128xf32>
    %cst_51 = arith.constant dense<0.000000e+00> : vector<128xf32>
    %159 = vector.multi_reduction <add>, %158, %cst_51 [0] : vector<64x128xf32> to vector<128xf32>
    %160 = vector.shape_cast %159 : vector<128xf32> to vector<1x128xf32>
    %161 = arith.mulf %155, %7 : vector<64x128xf32>
    %cst_52 = arith.constant dense<0.000000e+00> : vector<128xf32>
    %162 = vector.multi_reduction <add>, %161, %cst_52 [0] : vector<64x128xf32> to vector<128xf32>
    %163 = vector.shape_cast %162 : vector<128xf32> to vector<1x128xf32>
    %cst_53 = arith.constant 0.866666674 : f32
    %164 = vector.broadcast %cst_53 : f32 to vector<64x128xf32>
    %165 = arith.cmpf ogt, %4, %164 : vector<64x128xf32>
    %166 = arith.extui %165 : vector<64x128xi1> to vector<64x128xi32>
    %167 = arith.sitofp %166 : vector<64x128xi32> to vector<64x128xf32>
    %cst_54 = arith.constant dense<0.000000e+00> : vector<128xf32>
    %168 = vector.multi_reduction <add>, %167, %cst_54 [0] : vector<64x128xf32> to vector<128xf32>
    %169 = vector.shape_cast %168 : vector<128xf32> to vector<1x128xf32>
    %170 = arith.mulf %167, %4 : vector<64x128xf32>
    %cst_55 = arith.constant dense<0.000000e+00> : vector<128xf32>
    %171 = vector.multi_reduction <add>, %170, %cst_55 [0] : vector<64x128xf32> to vector<128xf32>
    %172 = vector.shape_cast %171 : vector<128xf32> to vector<1x128xf32>
    %173 = arith.mulf %167, %7 : vector<64x128xf32>
    %cst_56 = arith.constant dense<0.000000e+00> : vector<128xf32>
    %174 = vector.multi_reduction <add>, %173, %cst_56 [0] : vector<64x128xf32> to vector<128xf32>
    %175 = vector.shape_cast %174 : vector<128xf32> to vector<1x128xf32>
    %cst_57 = arith.constant 0.933333337 : f32
    %176 = vector.broadcast %cst_57 : f32 to vector<64x128xf32>
    %177 = arith.cmpf ogt, %4, %176 : vector<64x128xf32>
    %178 = arith.extui %177 : vector<64x128xi1> to vector<64x128xi32>
    %179 = arith.sitofp %178 : vector<64x128xi32> to vector<64x128xf32>
    %cst_58 = arith.constant dense<0.000000e+00> : vector<128xf32>
    %180 = vector.multi_reduction <add>, %179, %cst_58 [0] : vector<64x128xf32> to vector<128xf32>
    %181 = vector.shape_cast %180 : vector<128xf32> to vector<1x128xf32>
    %182 = arith.mulf %179, %4 : vector<64x128xf32>
    %cst_59 = arith.constant dense<0.000000e+00> : vector<128xf32>
    %183 = vector.multi_reduction <add>, %182, %cst_59 [0] : vector<64x128xf32> to vector<128xf32>
    %184 = vector.shape_cast %183 : vector<128xf32> to vector<1x128xf32>
    %185 = arith.mulf %179, %7 : vector<64x128xf32>
    %cst_60 = arith.constant dense<0.000000e+00> : vector<128xf32>
    %186 = vector.multi_reduction <add>, %185, %cst_60 [0] : vector<64x128xf32> to vector<128xf32>
    %187 = vector.shape_cast %186 : vector<128xf32> to vector<1x128xf32>
    %cst_61 = arith.constant 1.000000e+00 : f32
    %188 = vector.broadcast %cst_61 : f32 to vector<64x128xf32>
    %189 = arith.cmpf ogt, %4, %188 : vector<64x128xf32>
    %190 = arith.extui %189 : vector<64x128xi1> to vector<64x128xi32>
    %191 = arith.sitofp %190 : vector<64x128xi32> to vector<64x128xf32>
    %cst_62 = arith.constant dense<0.000000e+00> : vector<128xf32>
    %192 = vector.multi_reduction <add>, %191, %cst_62 [0] : vector<64x128xf32> to vector<128xf32>
    %193 = vector.shape_cast %192 : vector<128xf32> to vector<1x128xf32>
    %194 = arith.mulf %191, %4 : vector<64x128xf32>
    %cst_63 = arith.constant dense<0.000000e+00> : vector<128xf32>
    %195 = vector.multi_reduction <add>, %194, %cst_63 [0] : vector<64x128xf32> to vector<128xf32>
    %196 = vector.shape_cast %195 : vector<128xf32> to vector<1x128xf32>
    %197 = arith.mulf %191, %7 : vector<64x128xf32>
    %cst_64 = arith.constant dense<0.000000e+00> : vector<128xf32>
    %198 = vector.multi_reduction <add>, %197, %cst_64 [0] : vector<64x128xf32> to vector<128xf32>
    %199 = vector.shape_cast %198 : vector<128xf32> to vector<1x128xf32>
    %200 = tpu.concatenate %13, %25, %37, %49, %61, %73, %85, %97, %109, %121, %133, %145, %157, %169, %181, %193 in 0 : vector<1x128xf32>, vector<1x128xf32>, vector<1x128xf32>, vector<1x128xf32>, vector<1x128xf32>, vector<1x128xf32>, vector<1x128xf32>, vector<1x128xf32>, vector<1x128xf32>, vector<1x128xf32>, vector<1x128xf32>, vector<1x128xf32>, vector<1x128xf32>, vector<1x128xf32>, vector<1x128xf32>, vector<1x128xf32> -> vector<16x128xf32>
    %201 = tpu.concatenate %16, %28, %40, %52, %64, %76, %88, %100, %112, %124, %136, %148, %160, %172, %184, %196 in 0 : vector<1x128xf32>, vector<1x128xf32>, vector<1x128xf32>, vector<1x128xf32>, vector<1x128xf32>, vector<1x128xf32>, vector<1x128xf32>, vector<1x128xf32>, vector<1x128xf32>, vector<1x128xf32>, vector<1x128xf32>, vector<1x128xf32>, vector<1x128xf32>, vector<1x128xf32>, vector<1x128xf32>, vector<1x128xf32> -> vector<16x128xf32>
    %202 = tpu.concatenate %19, %31, %43, %55, %67, %79, %91, %103, %115, %127, %139, %151, %163, %175, %187, %199 in 0 : vector<1x128xf32>, vector<1x128xf32>, vector<1x128xf32>, vector<1x128xf32>, vector<1x128xf32>, vector<1x128xf32>, vector<1x128xf32>, vector<1x128xf32>, vector<1x128xf32>, vector<1x128xf32>, vector<1x128xf32>, vector<1x128xf32>, vector<1x128xf32>, vector<1x128xf32>, vector<1x128xf32>, vector<1x128xf32> -> vector<16x128xf32>
    %203 = tpu.concatenate %200, %201, %202 in 0 : vector<16x128xf32>, vector<16x128xf32>, vector<16x128xf32> -> vector<48x128xf32>
    %204 = arith.addf %0, %203 : vector<48x128xf32>
    %c1_i32 = arith.constant 1 : i32
    %c0_65 = arith.constant 0 : index
    %c0_66 = arith.constant 0 : index
    %c0_67 = arith.constant 0 : index
    %205 = vector.load %arg3[%c0_65, %c0_66, %c0_67] : memref<1x48x128xf32, #tpu.memory_space<vmem>>, vector<1x48x128xf32>
    %206 = vector.shape_cast %205 : vector<1x48x128xf32> to vector<48x128xf32>
    %207 = vector.shape_cast %204 : vector<48x128xf32> to vector<1x48x128xf32>
    tpu.vector_store %arg3[%c0_65, %c0_66, %c0_67], %207 {strides = array<i32>} : memref<1x48x128xf32, #tpu.memory_space<vmem>>, vector<1x48x128xf32>,
    return
  }
  func.func @transform_0(%arg0: i32) -> (i32, i32) {
    %c0_i32 = arith.constant 0 : i32
    %c0_i32_0 = arith.constant 0 : i32
    return %arg0, %c0_i32 : i32, i32
  }
  func.func @transform_1(%arg0: i32) -> (i32, i32) {
    %c0_i32 = arith.constant 0 : i32
    %c0_i32_0 = arith.constant 0 : i32
    return %arg0, %c0_i32 : i32, i32
  }
  func.func @transform_2(%arg0: i32) -> (i32, i32, i32) {
    %c0_i32 = arith.constant 0 : i32
    %c0_i32_0 = arith.constant 0 : i32
    %c0_i32_1 = arith.constant 0 : i32
    return %arg0, %c0_i32, %c0_i32_0 : i32, i32, i32
  }
}

</mosaic_0001>

<bundles_post_ra>
// kernel: tpu_custom_call.1
= control target key start
LH: loop header
LB: loop body
LE: loop exit
PB: predicated region body
PF: predicated region fallthrough
CT: control target
= control target key end

     0   :  { %7 = vsyncpa [#allocation3], 0  ;;  %s2586_s0 = inlined_call_operand.hbm [shape: f32[64,128], index: 0, kind: input, shape index: {}]   ;;  %s2587_s1 = inlined_call_operand.hbm [shape: bf16[64,128], index: 1, kind: input, shape index: {}]   ;;  %s2588_s2 = inlined_call_operand.hbm [shape: f32[1,48,128], index: 2, kind: output, shape index: {}]  }
   0x1   :  { %8 = vsyncpa [#allocation6], 0 }
   0x2   :  { %9 = vsyncpa [#allocation4], 0  ;;  %s14_s11 = sshll.u32 %s2586_s0, 4  ;;  %s1662_s12 = smov [#allocation2]   ;;  %s15_s11 = int_to_ptr.hbm [resolvable:$true] %s14_s11 }
   0x3   :  { %s16_s13 = sshll.u32 %s1662_s12, 4  ;;  %s27_s16 = sshll.u32 %s2587_s1, 4  ;;  %s17_s13 = int_to_ptr.vmem [resolvable:$true] %s16_s13  ;;  %s28_s16 = int_to_ptr.hbm [resolvable:$true] %s27_s16 }
   0x4   :  { %s1663_s17 = smov 128   ;;  %s1664_s18 = smov 8  }
   0x5   :  { %22 = dma.hbm_to_vmem [thread:$0]  %s15_s11, 1024, %s17_s13, [#allocation3], %s1663_s17, %s1663_s17, %s1664_s18  }
   0x6   :  { %s1665_s19 = smov [#allocation5]   ;;  %s1666_s21 = smov 64  }
   0x7   :  { %s29_s20 = sshll.u32 %s1665_s19, 4  ;;  %s1667_s0 = smov 4   ;;  %s30_s20 = int_to_ptr.vmem [resolvable:$true] %s29_s20 }
   0x8   :  { %35 = dma.hbm_to_vmem [thread:$0]  %s28_s16, 512, %s30_s20, [#allocation6], %s1666_s21, %s1666_s21, %s1667_s0  }
   0x9   :  { %1656 = dma.done.wait [#allocation3], 1024  }
   0xa   :  { %1657 = vsyncadd [#allocation3], 4294966272 }
   0xb   :  { %1658 = dma.done.wait [#allocation6], 512  }
   0xc   :  { %1659 = vsyncadd [#allocation6], 4294966784  ;;  %v1694_v0 = vld [vmem:[#allocation2] sm:$0xff]  ;;  %v1696_v1 = vld [vmem:[#allocation2 + $0x8] sm:$0xff]  ;;  %v2589_v18 = vmov 0.0   ;;  %s1669_s1 = smov [#allocation7]  }
   0xd   :  { %v1698_v2 = vld [vmem:[#allocation2 + $0x10] sm:$0xff]  ;;  %v1700_v3 = vld [vmem:[#allocation2 + $0x18] sm:$0xff]  ;;  %v1702_v4 = vld [vmem:[#allocation2 + $0x20] sm:$0xff]  ;;  %vm68_vm0 = vcmp.gt.f32.partialorder %v1694_v0, 0.0  ;;  %vm69_vm1 = vcmp.gt.f32.partialorder %v1696_v1, 0.0  ;;  %s1397_s22 = sshll.u32 %s1669_s1, 4  ;;  %s1398_s22 = int_to_ptr.vmem [resolvable:$true] %s1397_s22 }
   0xe   :  { %v1704_v5 = vld [vmem:[#allocation2 + $0x28] sm:$0xff]  ;;  %v1707_v6 = vld [vmem:[#allocation2 + $0x30] sm:$0xff]  ;;  %v1709_v7 = vld [vmem:[#allocation2 + $0x38] sm:$0xff]  ;;  %vm70_vm2 = vcmp.gt.f32.partialorder %v1698_v2, 0.0  ;;  %vm71_vm3 = vcmp.gt.f32.partialorder %v1700_v3, 0.0  ;;  %vm72_vm4 = vcmp.gt.f32.partialorder %v1702_v4, 0.0 }
   0xf   :  { %v1542_v8 = vld [vmem:[#allocation5] sm:$0xff]   ;;  %v1557_v11 = vld [vmem:[#allocation5 + $0x8] sm:$0xff]   ;;  %v1558_v12 = vld [vmem:[#allocation5 + $0x10] sm:$0xff]   ;;  %vm73_vm5 = vcmp.gt.f32.partialorder %v1704_v5, 0.0  ;;  %vm74_vm6 = vcmp.gt.f32.partialorder %v1707_v6, 0.0  ;;  %vm75_vm7 = vcmp.gt.f32.partialorder %v1709_v7, 0.0 }
  0x10   :  { %v1714_v9 = vunpack.c.l.bf16 %v1542_v8  ;;  %v1716_v10 = vunpack.c.h.bf16 %v1542_v8  ;;  %v1720_v13 = vunpack.c.l.bf16 %v1557_v11  ;;  %v1722_v14 = vunpack.c.h.bf16 %v1557_v11  ;;  %v1559_v15 = vld [vmem:[#allocation5 + $0x18] sm:$0xff]   ;;  %s1399_s25 = sshll.u32 %s2588_s2, 4  ;;  %s1400_s25 = int_to_ptr.hbm [resolvable:$true] %s1399_s25 }
  0x11   :  { %v1726_v16 = vunpack.c.l.bf16 %v1558_v12  ;;  %v1728_v17 = vunpack.c.h.bf16 %v1558_v12  ;;  %v1413_v19 = vsel %vm68_vm0, 1.0, %v2589_v18  ;;  %v1414_v20 = vsel %vm69_vm1, 1.0, %v2589_v18 }
  0x12   :  { %v1415_v21 = vsel %vm70_vm2, 1.0, %v2589_v18  ;;  %v1416_v22 = vsel %vm71_vm3, 1.0, %v2589_v18  ;;  %v1417_v23 = vsel %vm72_vm4, 1.0, %v2589_v18  ;;  %v1418_v24 = vsel %vm73_vm5, 1.0, %v2589_v18 }
  0x13   :  { %v1744_v25 = vunpack.c.l.bf16 %v1559_v15  ;;  %v1746_v26 = vunpack.c.h.bf16 %v1559_v15  ;;  %v92_v27 = vadd.f32 %v1414_v20, %v1413_v19  ;;  %v105_v28 = vmul.f32 %v1413_v19, %v1694_v0 }
  0x14   :  { %v1419_v29 = vsel %vm74_vm6, 1.0, %v2589_v18  ;;  %v1420_v30 = vsel %vm75_vm7, 1.0, %v2589_v18  ;;  %v106_v31 = vmul.f32 %v1414_v20, %v1696_v1  ;;  %v107_v32 = vmul.f32 %v1415_v21, %v1698_v2 }
  0x15   :  { %v93_v33 = vadd.f32 %v1415_v21, %v92_v27  ;;  %v108_v34 = vmul.f32 %v1416_v22, %v1700_v3  ;;  %v109_v35 = vmul.f32 %v1417_v23, %v1702_v4  ;;  %v110_v36 = vmul.f32 %v1418_v24, %v1704_v5 }
  0x16   :  { %v113_v37 = vadd.f32 %v106_v31, %v105_v28  ;;  %v126_v38 = vmul.f32 %v1714_v9, %v1413_v19  ;;  %v127_v39 = vmul.f32 %v1716_v10, %v1414_v20  ;;  %v128_v40 = vmul.f32 %v1720_v13, %v1415_v21 }
  0x17   :  { %v94_v41 = vadd.f32 %v1416_v22, %v93_v33  ;;  %v111_v42 = vmul.f32 %v1419_v29, %v1707_v6  ;;  %v112_v43 = vmul.f32 %v1420_v30, %v1709_v7  ;;  %v129_v44 = vmul.f32 %v1722_v14, %v1416_v22 }
  0x18   :  { %v114_v45 = vadd.f32 %v113_v37, %v107_v32  ;;  %v130_v46 = vmul.f32 %v1726_v16, %v1417_v23  ;;  %v131_v47 = vmul.f32 %v1728_v17, %v1418_v24  ;;  %v134_v48 = vadd.f32 %v127_v39, %v126_v38 }
  0x19   :  { %v95_v49 = vadd.f32 %v1417_v23, %v94_v41  ;;  %v132_v50 = vmul.f32 %v1744_v25, %v1419_v29  ;;  %v133_v51 = vmul.f32 %v1746_v26, %v1420_v30  ;;  %vm147_vm8 = vcmp.gt.f32.partialorder %v1694_v0, 0.06666667 }
  0x1a   :  { %v115_v52 = vadd.f32 %v114_v45, %v108_v34  ;;  %v135_v53 = vadd.f32 %v134_v48, %v128_v40  ;;  %vm148_vm9 = vcmp.gt.f32.partialorder %v1696_v1, 0.06666667  ;;  %vm149_vm10 = vcmp.gt.f32.partialorder %v1698_v2, 0.06666667 }
  0x1b   :  { %v96_v54 = vadd.f32 %v1418_v24, %v95_v49  ;;  %vm150_vm11 = vcmp.gt.f32.partialorder %v1700_v3, 0.06666667  ;;  %vm151_vm12 = vcmp.gt.f32.partialorder %v1702_v4, 0.06666667  ;;  %vm152_vm13 = vcmp.gt.f32.partialorder %v1704_v5, 0.06666667 }
  0x1c   :  { %v116_v55 = vadd.f32 %v115_v52, %v109_v35  ;;  %v136_v56 = vadd.f32 %v135_v53, %v129_v44  ;;  %vm153_vm14 = vcmp.gt.f32.partialorder %v1707_v6, 0.06666667  ;;  %v1421_v57 = vsel %vm147_vm8, 1.0, %v2589_v18 }
  0x1d   :  { %v97_v58 = vadd.f32 %v1419_v29, %v96_v54  ;;  %vm154_vm15 = vcmp.gt.f32.partialorder %v1709_v7, 0.06666667  ;;  %v1422_v59 = vsel %vm148_vm9, 1.0, %v2589_v18  ;;  %v1423_v60 = vsel %vm149_vm10, 1.0, %v2589_v18 }
  0x1e   :  { %v117_v61 = vadd.f32 %v116_v55, %v110_v36  ;;  %v137_v62 = vadd.f32 %v136_v56, %v130_v46  ;;  %v1424_v63 = vsel %vm150_vm11, 1.0, %v2589_v18  ;;  %v1425_v8 = vsel %vm151_vm12, 1.0, %v2589_v18 }
  0x1f   :  { %v98_v11 = vadd.f32 %v1420_v30, %v97_v58  ;;  %v1426_v12 = vsel %vm152_vm13, 1.0, %v2589_v18  ;;  %v171_v15 = vadd.f32 %v1422_v59, %v1421_v57  ;;  %v184_v19 = vmul.f32 %v1421_v57, %v1694_v0 }
  0x20   :  { %v118_v20 = vadd.f32 %v117_v61, %v111_v42  ;;  %v138_v21 = vadd.f32 %v137_v62, %v131_v47  ;;  %v1427_v22 = vsel %vm153_vm14, 1.0, %v2589_v18  ;;  %v185_v23 = vmul.f32 %v1422_v59, %v1696_v1 }
  0x21   :  { %v99_v24 = vrot.slane %v98_v11, 4  ;;  %v1428_v27 = vsel %vm154_vm15, 1.0, %v2589_v18  ;;  %v172_v28 = vadd.f32 %v1423_v60, %v171_v15  ;;  %v186_v29 = vmul.f32 %v1423_v60, %v1698_v2 }
  0x22   :  { %v119_v30 = vadd.f32 %v118_v20, %v112_v43  ;;  %v139_v31 = vadd.f32 %v138_v21, %v132_v50  ;;  %v187_v32 = vmul.f32 %v1424_v63, %v1700_v3  ;;  %v188_v33 = vmul.f32 %v1425_v8, %v1702_v4 }
  0x23   :  { %v100_v34 = vadd.f32 %v99_v24, %v98_v11  ;;  %v173_v35 = vadd.f32 %v1424_v63, %v172_v28  ;;  %v189_v36 = vmul.f32 %v1426_v12, %v1704_v5  ;;  %v192_v37 = vadd.f32 %v185_v23, %v184_v19 }
  0x24   :  { %v120_v38 = vrot.slane %v119_v30, 4  ;;  %v140_v39 = vadd.f32 %v139_v31, %v133_v51  ;;  %v190_v40 = vmul.f32 %v1427_v22, %v1707_v6  ;;  %v205_v41 = vmul.f32 %v1714_v9, %v1421_v57 }
  0x25   :  { %v101_v42 = vrot.slane %v100_v34, 2  ;;  %v174_v44 = vadd.f32 %v1425_v8, %v173_v35  ;;  %v193_v45 = vadd.f32 %v192_v37, %v186_v29  ;;  %v206_v43 = vmul.f32 %v1716_v10, %v1422_v59 }
  0x26   :  { %v121_v46 = vadd.f32 %v120_v38, %v119_v30  ;;  %v141_v47 = vrot.slane %v140_v39, 4  ;;  %v191_v48 = vmul.f32 %v1428_v27, %v1709_v7  ;;  %v207_v49 = vmul.f32 %v1720_v13, %v1423_v60 }
  0x27   :  { %v102_v50 = vadd.f32 %v101_v42, %v100_v34  ;;  %v175_v52 = vadd.f32 %v1426_v12, %v174_v44  ;;  %v194_v53 = vadd.f32 %v193_v45, %v187_v32  ;;  %v208_v51 = vmul.f32 %v1722_v14, %v1424_v63 }
  0x28   :  { %v122_v54 = vrot.slane %v121_v46, 2  ;;  %v142_v55 = vadd.f32 %v141_v47, %v140_v39  ;;  %v209_v56 = vmul.f32 %v1726_v16, %v1425_v8  ;;  %v210_v57 = vmul.f32 %v1728_v17, %v1426_v12 }
  0x29   :  { %v103_v58 = vrot.slane %v102_v50, 1  ;;  %v176_v61 = vadd.f32 %v1427_v22, %v175_v52  ;;  %v195_v59 = vadd.f32 %v194_v53, %v188_v33  ;;  %v213_v62 = vadd.f32 %v206_v43, %v205_v41 }
  0x2a   :  { %v123_v11 = vadd.f32 %v122_v54, %v121_v46  ;;  %v143_v15 = vrot.slane %v142_v55, 2  ;;  %v211_v19 = vmul.f32 %v1744_v25, %v1427_v22  ;;  %v212_v60 = vmul.f32 %v1746_v26, %v1428_v27 }
  0x2b   :  { %v177_v20 = vadd.f32 %v1428_v27, %v176_v61  ;;  %v196_v21 = vadd.f32 %v195_v59, %v189_v36  ;;  %v214_v23 = vadd.f32 %v213_v62, %v207_v49  ;;  %vm226_vm0 = vcmp.gt.f32.partialorder %v1694_v0, 0.13333334 }
  0x2c   :  { %v1803_v63 = vadd.f32 %v103_v58, %v102_v50  ;;  %v124_v8 = vrot.slane %v123_v11, 1  ;;  %v144_v24 = vadd.f32 %v143_v15, %v142_v55  ;;  %vm227_vm1 = vcmp.gt.f32.partialorder %v1696_v1, 0.13333334 }
  0x2d   :  { %v178_v12 = vrot.slane %v177_v20, 4  ;;  %v197_v28 = vadd.f32 %v196_v21, %v190_v40  ;;  %v215_v29 = vadd.f32 %v214_v23, %v208_v51  ;;  %vm228_vm2 = vcmp.gt.f32.partialorder %v1698_v2, 0.13333334 }
  0x2e   :  { %v1807_v30 = vadd.f32 %v124_v8, %v123_v11  ;;  %v145_v22 = vrot.slane %v144_v24, 1  ;;  %vm229_vm3 = vcmp.gt.f32.partialorder %v1700_v3, 0.13333334  ;;  %vm230_vm4 = vcmp.gt.f32.partialorder %v1702_v4, 0.13333334 }
  0x2f   :  { %v179_v27 = vadd.f32 %v178_v12, %v177_v20  ;;  %v198_v31 = vadd.f32 %v197_v28, %v191_v48  ;;  %v216_v32 = vadd.f32 %v215_v29, %v209_v56  ;;  %vm231_vm5 = vcmp.gt.f32.partialorder %v1704_v5, 0.13333334 }
  0x30   :  { %2593 = vst [vmem:[#allocation11_spill] sm:$0xff] %v1807_v30  ;;  %v1812_v33 = vadd.f32 %v145_v22, %v144_v24  ;;  %vm232_vm6 = vcmp.gt.f32.partialorder %v1707_v6, 0.13333334  ;;  %vm233_vm7 = vcmp.gt.f32.partialorder %v1709_v7, 0.13333334  ;;  %v1429_v34 = vsel %vm226_vm0, 1.0, %v2589_v18 }
  0x31   :  { %v180_v35 = vrot.slane %v179_v27, 2  ;;  %v199_v36 = vrot.slane %v198_v31, 4  ;;  %v217_v37 = vadd.f32 %v216_v32, %v210_v57  ;;  %v1430_v38 = vsel %vm227_vm1, 1.0, %v2589_v18 }
  0x32   :  { %2594 = vst [vmem:[#allocation12_spill] sm:$0xff] %v1812_v33  ;;  %v1431_v39 = vsel %vm228_vm2, 1.0, %v2589_v18  ;;  %v1432_v40 = vsel %vm229_vm3, 1.0, %v2589_v18  ;;  %v1433_v41 = vsel %vm230_vm4, 1.0, %v2589_v18  ;;  %v1434_v42 = vsel %vm231_vm5, 1.0, %v2589_v18 }
  0x33   :  { %v181_v44 = vadd.f32 %v180_v35, %v179_v27  ;;  %v200_v45 = vadd.f32 %v199_v36, %v198_v31  ;;  %v218_v43 = vadd.f32 %v217_v37, %v211_v19  ;;  %v250_v46 = vadd.f32 %v1430_v38, %v1429_v34 }
  0x34   :  { %v1435_v47 = vsel %vm232_vm6, 1.0, %v2589_v18  ;;  %v1436_v48 = vsel %vm233_vm7, 1.0, %v2589_v18  ;;  %v263_v49 = vmul.f32 %v1429_v34, %v1694_v0  ;;  %v264_v50 = vmul.f32 %v1430_v38, %v1696_v1 }
  0x35   :  { %v182_v52 = vrot.slane %v181_v44, 1  ;;  %v201_v53 = vrot.slane %v200_v45, 2  ;;  %v219_v51 = vadd.f32 %v218_v43, %v212_v60  ;;  %v251_v54 = vadd.f32 %v1431_v39, %v250_v46 }
  0x36   :  { %v265_v55 = vmul.f32 %v1431_v39, %v1698_v2  ;;  %v266_v56 = vmul.f32 %v1432_v40, %v1700_v3  ;;  %v267_v57 = vmul.f32 %v1433_v41, %v1702_v4  ;;  %v268_v58 = vmul.f32 %v1434_v42, %v1704_v5 }
  0x37   :  { %v202_v61 = vadd.f32 %v201_v53, %v200_v45  ;;  %v220_v59 = vrot.slane %v219_v51, 4  ;;  %v252_v62 = vadd.f32 %v1432_v40, %v251_v54  ;;  %v269_v11 = vmul.f32 %v1435_v47, %v1707_v6 }
  0x38   :  { %v270_v15 = vmul.f32 %v1436_v48, %v1709_v7  ;;  %v271_v19 = vadd.f32 %v264_v50, %v263_v49  ;;  %v284_v20 = vmul.f32 %v1714_v9, %v1429_v34  ;;  %v285_v60 = vmul.f32 %v1716_v10, %v1430_v38 }
  0x39   :  { %v1840_v21 = vadd.f32 %v182_v52, %v181_v44  ;;  %v203_v23 = vrot.slane %v202_v61, 1  ;;  %v221_v8 = vadd.f32 %v220_v59, %v219_v51  ;;  %v253_v24 = vadd.f32 %v1433_v41, %v252_v62 }
  0x3a   :  { %v272_v12 = vadd.f32 %v271_v19, %v265_v55  ;;  %v286_v28 = vmul.f32 %v1720_v13, %v1431_v39  ;;  %v287_v29 = vmul.f32 %v1722_v14, %v1432_v40  ;;  %v288_v22 = vmul.f32 %v1726_v16, %v1433_v41 }
  0x3b   :  { %v222_v27 = vrot.slane %v221_v8, 2  ;;  %v254_v31 = vadd.f32 %v1434_v42, %v253_v24  ;;  %v289_v32 = vmul.f32 %v1728_v17, %v1434_v42  ;;  %v290_v34 = vmul.f32 %v1744_v25, %v1435_v47 }
  0x3c   :  { %v1847_v35 = vadd.f32 %v203_v23, %v202_v61  ;;  %v273_v36 = vadd.f32 %v272_v12, %v266_v56  ;;  %v291_v37 = vmul.f32 %v1746_v26, %v1436_v48  ;;  %v292_v38 = vadd.f32 %v285_v60, %v284_v20 }
  0x3d   :  { %v223_v44 = vadd.f32 %v222_v27, %v221_v8  ;;  %v255_v45 = vadd.f32 %v1435_v47, %v254_v31  ;;  %vm305_vm8 = vcmp.gt.f32.partialorder %v1694_v0, 0.2  ;;  %vm306_vm9 = vcmp.gt.f32.partialorder %v1696_v1, 0.2 }
  0x3e   :  { %2595 = vst [vmem:[#allocation13_spill] sm:$0xff] %v1847_v35  ;;  %v274_v39 = vadd.f32 %v273_v36, %v267_v57  ;;  %v293_v40 = vadd.f32 %v292_v38, %v286_v28  ;;  %vm307_vm10 = vcmp.gt.f32.partialorder %v1698_v2, 0.2  ;;  %vm308_vm11 = vcmp.gt.f32.partialorder %v1700_v3, 0.2 }
  0x3f   :  { %v224_v41 = vrot.slane %v223_v44, 1  ;;  %v256_v42 = vadd.f32 %v1436_v48, %v255_v45  ;;  %vm309_vm12 = vcmp.gt.f32.partialorder %v1702_v4, 0.2  ;;  %vm310_vm13 = vcmp.gt.f32.partialorder %v1704_v5, 0.2 }
  0x40   :  { %v275_v43 = vadd.f32 %v274_v39, %v268_v58  ;;  %v294_v46 = vadd.f32 %v293_v40, %v287_v29  ;;  %vm311_vm14 = vcmp.gt.f32.partialorder %v1707_v6, 0.2  ;;  %vm312_vm15 = vcmp.gt.f32.partialorder %v1709_v7, 0.2 }
  0x41   :  { %v1858_v47 = vadd.f32 %v224_v41, %v223_v44  ;;  %v257_v49 = vrot.slane %v256_v42, 4  ;;  %v1437_v50 = vsel %vm305_vm8, 1.0, %v2589_v18  ;;  %v1438_v48 = vsel %vm306_vm9, 1.0, %v2589_v18 }
  0x42   :  { %v276_v52 = vadd.f32 %v275_v43, %v269_v11  ;;  %v295_v53 = vadd.f32 %v294_v46, %v288_v22  ;;  %v1439_v51 = vsel %vm307_vm10, 1.0, %v2589_v18  ;;  %v1440_v54 = vsel %vm308_vm11, 1.0, %v2589_v18 }
  0x43   :  { %2596 = vst [vmem:[#allocation14_spill] sm:$0xff] %v1858_v47  ;;  %v258_v55 = vadd.f32 %v257_v49, %v256_v42  ;;  %v1441_v56 = vsel %vm309_vm12, 1.0, %v2589_v18  ;;  %v1442_v57 = vsel %vm310_vm13, 1.0, %v2589_v18  ;;  %v329_v58 = vadd.f32 %v1438_v48, %v1437_v50 }
  0x44   :  { %v277_v61 = vadd.f32 %v276_v52, %v270_v15  ;;  %v296_v59 = vadd.f32 %v295_v53, %v289_v32  ;;  %v342_v62 = vmul.f32 %v1437_v50, %v1694_v0  ;;  %v343_v11 = vmul.f32 %v1438_v48, %v1696_v1 }
  0x45   :  { %v259_v19 = vrot.slane %v258_v55, 2  ;;  %v1443_v20 = vsel %vm311_vm14, 1.0, %v2589_v18  ;;  %v1444_v60 = vsel %vm312_vm15, 1.0, %v2589_v18  ;;  %v330_v23 = vadd.f32 %v1439_v51, %v329_v58 }
  0x46   :  { %v278_v8 = vrot.slane %v277_v61, 4  ;;  %v297_v24 = vadd.f32 %v296_v59, %v290_v34  ;;  %v344_v12 = vmul.f32 %v1439_v51, %v1698_v2  ;;  %v345_v15 = vmul.f32 %v1440_v54, %v1700_v3 }
  0x47   :  { %v260_v28 = vadd.f32 %v259_v19, %v258_v55  ;;  %v331_v29 = vadd.f32 %v1440_v54, %v330_v23  ;;  %v346_v22 = vmul.f32 %v1441_v56, %v1702_v4  ;;  %v347_v27 = vmul.f32 %v1442_v57, %v1704_v5 }
  0x48   :  { %v279_v31 = vadd.f32 %v278_v8, %v277_v61  ;;  %v298_v32 = vadd.f32 %v297_v24, %v291_v37  ;;  %v348_v36 = vmul.f32 %v1443_v20, %v1707_v6  ;;  %v350_v38 = vadd.f32 %v343_v11, %v342_v62 }
  0x49   :  { %v261_v44 = vrot.slane %v260_v28, 1  ;;  %v332_v45 = vadd.f32 %v1441_v56, %v331_v29  ;;  %v363_v39 = vmul.f32 %v1714_v9, %v1437_v50  ;;  %v364_v34 = vmul.f32 %v1716_v10, %v1438_v48 }
  0x4a   :  { %v280_v40 = vrot.slane %v279_v31, 2  ;;  %v299_v41 = vrot.slane %v298_v32, 4  ;;  %v349_v42 = vmul.f32 %v1444_v60, %v1709_v7  ;;  %v351_v43 = vadd.f32 %v350_v38, %v344_v12 }
  0x4b   :  { %v1890_v46 = vadd.f32 %v261_v44, %v260_v28  ;;  %v333_v49 = vadd.f32 %v1442_v57, %v332_v45  ;;  %v365_v52 = vmul.f32 %v1720_v13, %v1439_v51  ;;  %v366_v37 = vmul.f32 %v1722_v14, %v1440_v54 }
  0x4c   :  { %v281_v53 = vadd.f32 %v280_v40, %v279_v31  ;;  %v300_v55 = vadd.f32 %v299_v41, %v298_v32  ;;  %v352_v58 = vadd.f32 %v351_v43, %v345_v15  ;;  %v367_v61 = vmul.f32 %v1726_v16, %v1441_v56 }
  0x4d   :  { %v334_v50 = vadd.f32 %v1443_v20, %v333_v49  ;;  %v368_v48 = vmul.f32 %v1728_v17, %v1442_v57  ;;  %v369_v59 = vmul.f32 %v1744_v25, %v1443_v20  ;;  %v371_v62 = vadd.f32 %v364_v34, %v363_v39 }
  0x4e   :  { %v282_v11 = vrot.slane %v281_v53, 1  ;;  %v301_v19 = vrot.slane %v300_v55, 2  ;;  %v353_v23 = vadd.f32 %v352_v58, %v346_v22  ;;  %v370_v8 = vmul.f32 %v1746_v26, %v1444_v60 }
  0x4f   :  { %v335_v24 = vadd.f32 %v1444_v60, %v334_v50  ;;  %v372_v51 = vadd.f32 %v371_v62, %v365_v52  ;;  %vm384_vm0 = vcmp.gt.f32.partialorder %v1694_v0, 0.26666668  ;;  %vm385_vm1 = vcmp.gt.f32.partialorder %v1696_v1, 0.26666668 }
  0x50   :  { %v302_v54 = vadd.f32 %v301_v19, %v300_v55  ;;  %v354_v12 = vadd.f32 %v353_v23, %v347_v27  ;;  %vm386_vm2 = vcmp.gt.f32.partialorder %v1698_v2, 0.26666668  ;;  %vm387_vm3 = vcmp.gt.f32.partialorder %v1700_v3, 0.26666668 }
  0x51   :  { %v1902_v56 = vadd.f32 %v282_v11, %v281_v53  ;;  %v336_v57 = vrot.slane %v335_v24, 4  ;;  %v373_v20 = vadd.f32 %v372_v51, %v366_v37  ;;  %vm388_vm4 = vcmp.gt.f32.partialorder %v1702_v4, 0.26666668 }
  0x52   :  { %v303_v15 = vrot.slane %v302_v54, 1  ;;  %v355_v28 = vadd.f32 %v354_v12, %v348_v36  ;;  %vm389_vm5 = vcmp.gt.f32.partialorder %v1704_v5, 0.26666668  ;;  %vm390_vm6 = vcmp.gt.f32.partialorder %v1707_v6, 0.26666668 }
  0x53   :  { %2597 = vst [vmem:[#allocation15_spill] sm:$0xff] %v1902_v56  ;;  %v337_v60 = vadd.f32 %v336_v57, %v335_v24  ;;  %v374_v29 = vadd.f32 %v373_v20, %v367_v61  ;;  %vm391_vm7 = vcmp.gt.f32.partialorder %v1709_v7, 0.26666668  ;;  %v1445_v22 = vsel %vm384_vm0, 1.0, %v2589_v18 }
  0x54   :  { %v1911_v27 = vadd.f32 %v303_v15, %v302_v54  ;;  %v356_v31 = vadd.f32 %v355_v28, %v349_v42  ;;  %v1446_v32 = vsel %vm385_vm1, 1.0, %v2589_v18  ;;  %v1447_v36 = vsel %vm386_vm2, 1.0, %v2589_v18 }
  0x55   :  { %v338_v38 = vrot.slane %v337_v60, 2  ;;  %v375_v44 = vadd.f32 %v374_v29, %v368_v48  ;;  %v1448_v45 = vsel %vm387_vm3, 1.0, %v2589_v18  ;;  %v1449_v39 = vsel %vm388_vm4, 1.0, %v2589_v18 }
  0x56   :  { %2598 = vst [vmem:[#allocation16_spill] sm:$0xff] %v1911_v27  ;;  %v357_v34 = vrot.slane %v356_v31, 4  ;;  %v1450_v40 = vsel %vm389_vm5, 1.0, %v2589_v18  ;;  %v408_v41 = vadd.f32 %v1446_v32, %v1445_v22  ;;  %v421_v42 = vmul.f32 %v1445_v22, %v1694_v0 }
  0x57   :  { %v339_v43 = vadd.f32 %v338_v38, %v337_v60  ;;  %v376_v49 = vadd.f32 %v375_v44, %v369_v59  ;;  %v1451_v52 = vsel %vm390_vm6, 1.0, %v2589_v18  ;;  %v422_v37 = vmul.f32 %v1446_v32, %v1696_v1 }
  0x58   :  { %v358_v53 = vadd.f32 %v357_v34, %v356_v31  ;;  %v1452_v55 = vsel %vm391_vm7, 1.0, %v2589_v18  ;;  %v409_v58 = vadd.f32 %v1447_v36, %v408_v41  ;;  %v423_v61 = vmul.f32 %v1447_v36, %v1698_v2 }
  0x59   :  { %v340_v50 = vrot.slane %v339_v43, 1  ;;  %v377_v48 = vadd.f32 %v376_v49, %v370_v8  ;;  %v424_v62 = vmul.f32 %v1448_v45, %v1700_v3  ;;  %v425_v59 = vmul.f32 %v1449_v39, %v1702_v4 }
  0x5a   :  { %v359_v11 = vrot.slane %v358_v53, 2  ;;  %v410_v19 = vadd.f32 %v1448_v45, %v409_v58  ;;  %v426_v23 = vmul.f32 %v1450_v40, %v1704_v5  ;;  %v429_v24 = vadd.f32 %v422_v37, %v421_v42 }
  0x5b   :  { %v378_v51 = vrot.slane %v377_v48, 4  ;;  %v427_v54 = vmul.f32 %v1451_v52, %v1707_v6  ;;  %v442_v12 = vmul.f32 %v1714_v9, %v1445_v22  ;;  %v443_v57 = vmul.f32 %v1716_v10, %v1446_v32 }
  0x5c   :  { %v360_v20 = vadd.f32 %v359_v11, %v358_v53  ;;  %v411_v15 = vadd.f32 %v1449_v39, %v410_v19  ;;  %v428_v8 = vmul.f32 %v1452_v55, %v1709_v7  ;;  %v430_v28 = vadd.f32 %v429_v24, %v423_v61 }
  0x5d   :  { %v1942_v60 = vadd.f32 %v340_v50, %v339_v43  ;;  %v379_v29 = vadd.f32 %v378_v51, %v377_v48  ;;  %v444_v31 = vmul.f32 %v1720_v13, %v1447_v36  ;;  %v445_v38 = vmul.f32 %v1722_v14, %v1448_v45 }
  0x5e   :  { %v361_v44 = vrot.slane %v360_v20, 1  ;;  %v412_v34 = vadd.f32 %v1450_v40, %v411_v15  ;;  %v431_v41 = vadd.f32 %v430_v28, %v424_v62  ;;  %v446_v42 = vmul.f32 %v1726_v16, %v1449_v39 }
  0x5f   :  { %v380_v22 = vrot.slane %v379_v29, 2  ;;  %v447_v32 = vmul.f32 %v1728_v17, %v1450_v40  ;;  %v448_v49 = vmul.f32 %v1744_v25, %v1451_v52  ;;  %v450_v37 = vadd.f32 %v443_v57, %v442_v12 }
  0x60   :  { %v413_v53 = vadd.f32 %v1451_v52, %v412_v34  ;;  %v432_v58 = vadd.f32 %v431_v41, %v425_v59  ;;  %v449_v43 = vmul.f32 %v1746_v26, %v1452_v55  ;;  %vm463_vm8 = vcmp.gt.f32.partialorder %v1694_v0, 0.33333334 }
  0x61   :  { %v1951_v36 = vadd.f32 %v361_v44, %v360_v20  ;;  %v381_v45 = vadd.f32 %v380_v22, %v379_v29  ;;  %v451_v61 = vadd.f32 %v450_v37, %v444_v31  ;;  %vm464_vm9 = vcmp.gt.f32.partialorder %v1696_v1, 0.33333334 }
  0x62   :  { %v414_v50 = vadd.f32 %v1452_v55, %v413_v53  ;;  %v433_v39 = vadd.f32 %v432_v58, %v426_v23  ;;  %vm465_vm10 = vcmp.gt.f32.partialorder %v1698_v2, 0.33333334  ;;  %vm466_vm11 = vcmp.gt.f32.partialorder %v1700_v3, 0.33333334 }
  0x63   :  { %2599 = vst [vmem:[#allocation17_spill] sm:$0xff] %v1951_v36  ;;  %v382_v40 = vrot.slane %v381_v45, 1  ;;  %v452_v48 = vadd.f32 %v451_v61, %v445_v38  ;;  %vm467_vm12 = vcmp.gt.f32.partialorder %v1702_v4, 0.33333334  ;;  %vm468_vm13 = vcmp.gt.f32.partialorder %v1704_v5, 0.33333334 }
  0x64   :  { %v415_v52 = vrot.slane %v414_v50, 4  ;;  %v434_v62 = vadd.f32 %v433_v39, %v427_v54  ;;  %vm469_vm14 = vcmp.gt.f32.partialorder %v1707_v6, 0.33333334  ;;  %vm470_vm15 = vcmp.gt.f32.partialorder %v1709_v7, 0.33333334 }
  0x65   :  { %v1960_v59 = vadd.f32 %v382_v40, %v381_v45  ;;  %v453_v55 = vadd.f32 %v452_v48, %v446_v42  ;;  %v1453_v11 = vsel %vm463_vm8, 1.0, %v2589_v18  ;;  %v1454_v19 = vsel %vm464_vm9, 1.0, %v2589_v18 }
  0x66   :  { %v416_v23 = vadd.f32 %v415_v52, %v414_v50  ;;  %v435_v24 = vadd.f32 %v434_v62, %v428_v8  ;;  %v1455_v51 = vsel %vm465_vm10, 1.0, %v2589_v18  ;;  %v1456_v54 = vsel %vm466_vm11, 1.0, %v2589_v18 }
  0x67   :  { %2600 = vst [vmem:[#allocation18_spill] sm:$0xff] %v1960_v59  ;;  %v454_v12 = vadd.f32 %v453_v55, %v447_v32  ;;  %v1457_v57 = vsel %vm467_vm12, 1.0, %v2589_v18  ;;  %v1458_v20 = vsel %vm468_vm13, 1.0, %v2589_v18  ;;  %v487_v15 = vadd.f32 %v1454_v19, %v1453_v11 }
  0x68   :  { %v417_v28 = vrot.slane %v416_v23, 2  ;;  %v436_v29 = vrot.slane %v435_v24, 4  ;;  %v500_v31 = vmul.f32 %v1453_v11, %v1694_v0  ;;  %v501_v8 = vmul.f32 %v1454_v19, %v1696_v1 }
  0x69   :  { %v455_v38 = vadd.f32 %v454_v12, %v448_v49  ;;  %v1459_v44 = vsel %vm469_vm14, 1.0, %v2589_v18  ;;  %v1460_v34 = vsel %vm470_vm15, 1.0, %v2589_v18  ;;  %v488_v41 = vadd.f32 %v1455_v51, %v487_v15 }
  0x6a   :  { %v418_v42 = vadd.f32 %v417_v28, %v416_v23  ;;  %v437_v22 = vadd.f32 %v436_v29, %v435_v24  ;;  %v502_v32 = vmul.f32 %v1455_v51, %v1698_v2  ;;  %v503_v37 = vmul.f32 %v1456_v54, %v1700_v3 }
  0x6b   :  { %v456_v53 = vadd.f32 %v455_v38, %v449_v43  ;;  %v489_v58 = vadd.f32 %v1456_v54, %v488_v41  ;;  %v504_v45 = vmul.f32 %v1457_v57, %v1702_v4  ;;  %v505_v49 = vmul.f32 %v1458_v20, %v1704_v5 }
  0x6c   :  { %v419_v61 = vrot.slane %v418_v42, 1  ;;  %v438_v50 = vrot.slane %v437_v22, 2  ;;  %v506_v39 = vmul.f32 %v1459_v44, %v1707_v6  ;;  %v508_v40 = vadd.f32 %v501_v8, %v500_v31 }
  0x6d   :  { %v457_v48 = vrot.slane %v456_v53, 4  ;;  %v490_v52 = vadd.f32 %v1457_v57, %v489_v58  ;;  %v521_v62 = vmul.f32 %v1714_v9, %v1453_v11  ;;  %v522_v55 = vmul.f32 %v1716_v10, %v1454_v19 }
  0x6e   :  { %v439_v23 = vadd.f32 %v438_v50, %v437_v22  ;;  %v507_v24 = vmul.f32 %v1460_v34, %v1709_v7  ;;  %v509_v43 = vadd.f32 %v508_v40, %v502_v32  ;;  %v523_v12 = vmul.f32 %v1720_v13, %v1455_v51 }
  0x6f   :  { %v1993_v15 = vadd.f32 %v419_v61, %v418_v42  ;;  %v458_v28 = vadd.f32 %v457_v48, %v456_v53  ;;  %v491_v29 = vadd.f32 %v1458_v20, %v490_v52  ;;  %v524_v38 = vmul.f32 %v1722_v14, %v1456_v54 }
  0x70   :  { %v440_v41 = vrot.slane %v439_v23, 1  ;;  %v510_v31 = vadd.f32 %v509_v43, %v503_v37  ;;  %v525_v8 = vmul.f32 %v1726_v16, %v1457_v57  ;;  %v526_v11 = vmul.f32 %v1728_v17, %v1458_v20 }
  0x71   :  { %v459_v58 = vrot.slane %v458_v28, 2  ;;  %v492_v19 = vadd.f32 %v1459_v44, %v491_v29  ;;  %v527_v22 = vmul.f32 %v1744_v25, %v1459_v44  ;;  %v529_v50 = vadd.f32 %v522_v55, %v521_v62 }
  0x72   :  { %v1999_v32 = vadd.f32 %v440_v41, %v439_v23  ;;  %v511_v51 = vadd.f32 %v510_v31, %v504_v45  ;;  %v528_v42 = vmul.f32 %v1746_v26, %v1460_v34  ;;  %vm542_vm0 = vcmp.gt.f32.partialorder %v1694_v0, 0.4 }
  0x73   :  { %v460_v53 = vadd.f32 %v459_v58, %v458_v28  ;;  %v493_v54 = vadd.f32 %v1460_v34, %v492_v19  ;;  %v530_v61 = vadd.f32 %v529_v50, %v523_v12  ;;  %vm543_vm1 = vcmp.gt.f32.partialorder %v1696_v1, 0.4 }
  0x74   :  { %2601 = vst [vmem:[#allocation19_spill] sm:$0xff] %v1999_v32  ;;  %v512_v57 = vadd.f32 %v511_v51, %v505_v49  ;;  %vm544_vm2 = vcmp.gt.f32.partialorder %v1698_v2, 0.4  ;;  %vm545_vm3 = vcmp.gt.f32.partialorder %v1700_v3, 0.4  ;;  %v1461_v34 = vsel %vm542_vm0, 1.0, %v2589_v18 }
  0x75   :  { %vm546_vm4 = vcmp.gt.f32.partialorder %v1702_v4, 0.4  ;;  %v461_v20 = vrot.slane %v460_v53, 1  ;;  %v494_v44 = vrot.slane %v493_v54, 4  ;;  %v531_v37 = vadd.f32 %v530_v61, %v524_v38 }
  0x76   :  { %vm547_vm5 = vcmp.gt.f32.partialorder %v1704_v5, 0.4  ;;  %v513_v45 = vadd.f32 %v512_v57, %v506_v39  ;;  %vm548_vm6 = vcmp.gt.f32.partialorder %v1707_v6, 0.4  ;;  %vm549_vm7 = vcmp.gt.f32.partialorder %v1709_v7, 0.4 }
  0x77   :  { %v495_v49 = vadd.f32 %v494_v44, %v493_v54  ;;  %v532_v40 = vadd.f32 %v531_v37, %v525_v8  ;;  %v1462_v48 = vsel %vm543_vm1, 1.0, %v2589_v18  ;;  %v1463_v52 = vsel %vm544_vm2, 1.0, %v2589_v18 }
  0x78   :  { %v2015_v62 = vadd.f32 %v461_v20, %v460_v53  ;;  %v514_v55 = vadd.f32 %v513_v45, %v507_v24  ;;  %v1464_v39 = vsel %vm545_vm3, 1.0, %v2589_v18  ;;  %v1465_v23 = vsel %vm546_vm4, 1.0, %v2589_v18 }
  0x79   :  { %v496_v43 = vrot.slane %v495_v49, 2  ;;  %v533_v12 = vadd.f32 %v532_v40, %v526_v11  ;;  %v1466_v28 = vsel %vm547_vm5, 1.0, %v2589_v18  ;;  %v566_v29 = vadd.f32 %v1462_v48, %v1461_v34 }
  0x7a   :  { %2602 = vst [vmem:[#allocation20_spill] sm:$0xff] %v2015_v62  ;;  %v515_v38 = vrot.slane %v514_v55, 4  ;;  %v1467_v41 = vsel %vm548_vm6, 1.0, %v2589_v18  ;;  %v579_v24 = vmul.f32 %v1461_v34, %v1694_v0  ;;  %v580_v31 = vmul.f32 %v1462_v48, %v1696_v1 }
  0x7b   :  { %v497_v8 = vadd.f32 %v496_v43, %v495_v49  ;;  %v534_v58 = vadd.f32 %v533_v12, %v527_v22  ;;  %v1468_v19 = vsel %vm549_vm7, 1.0, %v2589_v18  ;;  %v567_v50 = vadd.f32 %v1463_v52, %v566_v29 }
  0x7c   :  { %v516_v11 = vadd.f32 %v515_v38, %v514_v55  ;;  %v581_v51 = vmul.f32 %v1463_v52, %v1698_v2  ;;  %v582_v53 = vmul.f32 %v1464_v39, %v1700_v3  ;;  %v583_v54 = vmul.f32 %v1465_v23, %v1702_v4 }
  0x7d   :  { %v498_v61 = vrot.slane %v497_v8, 1  ;;  %v535_v57 = vadd.f32 %v534_v58, %v528_v42  ;;  %v568_v20 = vadd.f32 %v1464_v39, %v567_v50  ;;  %v584_v44 = vmul.f32 %v1466_v28, %v1704_v5 }
  0x7e   :  { %v517_v37 = vrot.slane %v516_v11, 2  ;;  %v587_v45 = vadd.f32 %v580_v31, %v579_v24  ;;  %v600_v22 = vmul.f32 %v1714_v9, %v1461_v34  ;;  %v601_v49 = vmul.f32 %v1716_v10, %v1462_v48 }
  0x7f   :  { %v536_v40 = vrot.slane %v535_v57, 4  ;;  %v569_v43 = vadd.f32 %v1465_v23, %v568_v20  ;;  %v585_v55 = vmul.f32 %v1467_v41, %v1707_v6  ;;  %v586_v12 = vmul.f32 %v1468_v19, %v1709_v7 }
  0x80   :  { %v2040_v29 = vadd.f32 %v498_v61, %v497_v8  ;;  %v518_v38 = vadd.f32 %v517_v37, %v516_v11  ;;  %v588_v18 = vadd.f32 %v587_v45, %v581_v51  ;;  %v602_v42 = vmul.f32 %v1720_v13, %v1463_v52 }
  0x81   :  { %v537_v58 = vadd.f32 %v536_v40, %v535_v57  ;;  %v570_v50 = vadd.f32 %v1466_v28, %v569_v43  ;;  %v603_v24 = vmul.f32 %v1722_v14, %v1464_v39  ;;  %v604_v34 = vmul.f32 %v1726_v16, %v1465_v23 }
  0x82   :  { %v519_v31 = vrot.slane %v518_v38, 1  ;;  %v589_v48 = vadd.f32 %v588_v18, %v582_v53  ;;  %v605_v20 = vmul.f32 %v1728_v17, %v1466_v28  ;;  %v608_v62 = vadd.f32 %v601_v49, %v600_v22 }
  0x83   :  { %v538_v59 = vrot.slane %v537_v58, 2  ;;  %v571_v27 = vadd.f32 %v1467_v41, %v570_v50  ;;  %v606_v8 = vmul.f32 %v1744_v25, %v1467_v41  ;;  %v607_v11 = vmul.f32 %v1746_v26, %v1468_v19 }
  0x84   :  { %v590_v51 = vadd.f32 %v589_v48, %v583_v54  ;;  %v609_v61 = vadd.f32 %v608_v62, %v602_v42  ;;  %vm621_vm8 = vcmp.gt.f32.partialorder %v1694_v0, 0.46666667  ;;  %vm622_vm9 = vcmp.gt.f32.partialorder %v1696_v1, 0.46666667  ;;  %v2076_v1 = vld [vmem:[#allocation2] sm:$0xff] }
  0x85   :  { %v2050_v52 = vadd.f32 %v519_v31, %v518_v38  ;;  %v539_v39 = vadd.f32 %v538_v59, %v537_v58  ;;  %v572_v23 = vadd.f32 %v1468_v19, %v571_v27  ;;  %vm623_vm10 = vcmp.gt.f32.partialorder %v1698_v2, 0.46666667 }
  0x86   :  { %v591_v18 = vadd.f32 %v590_v51, %v584_v44  ;;  %v610_v28 = vadd.f32 %v609_v61, %v603_v24  ;;  %vm624_vm11 = vcmp.gt.f32.partialorder %v1700_v3, 0.46666667  ;;  %vm625_vm12 = vcmp.gt.f32.partialorder %v1702_v4, 0.46666667  ;;  %v2082_v3 = vld [vmem:[#allocation2 + $0x8] sm:$0xff]  ;;  %v2088_v24 = vld [vmem:[#allocation2 + $0x10] sm:$0xff] }
  0x87   :  { %2603 = vst [vmem:[#allocation21_spill] sm:$0xff] %v2050_v52  ;;  %v540_v41 = vrot.slane %v539_v39, 1  ;;  %v573_v53 = vrot.slane %v572_v23, 4  ;;  %vm626_vm13 = vcmp.gt.f32.partialorder %v1704_v5, 0.46666667  ;;  %v2604_v59 = vmov 0.0  }
  0x88   :  { %vm627_vm14 = vcmp.gt.f32.partialorder %v1707_v6, 0.46666667  ;;  %v592_v62 = vadd.f32 %v591_v18, %v585_v55  ;;  %v611_v54 = vadd.f32 %v610_v28, %v604_v34  ;;  %vm628_vm15 = vcmp.gt.f32.partialorder %v1709_v7, 0.46666667 }
  0x89   :  { %v1469_v27 = vsel %vm621_vm8, 1.0, %v2604_v59  ;;  %v2061_v19 = vadd.f32 %v540_v41, %v539_v39  ;;  %v574_v57 = vadd.f32 %v573_v53, %v572_v23  ;;  %v1470_v44 = vsel %vm622_vm9, 1.0, %v2604_v59  ;;  %v2097_v23 = vld [vmem:[#allocation2 + $0x28] sm:$0xff] }
  0x8a   :  { %v1471_v5 = vsel %vm623_vm10, 1.0, %v2604_v59  ;;  %v593_v37 = vadd.f32 %v592_v62, %v586_v12  ;;  %v612_v45 = vadd.f32 %v611_v54, %v605_v20  ;;  %v1472_v22 = vsel %vm624_vm11, 1.0, %v2604_v59  ;;  %v2091_v20 = vld [vmem:[#allocation2 + $0x18] sm:$0xff]  ;;  %v2102_v54 = vld [vmem:[#allocation2 + $0x30] sm:$0xff] }
  0x8b   :  { %2605 = vst [vmem:[#allocation22_spill] sm:$0xff] %v2061_v19  ;;  %v1473_v0 = vsel %vm625_vm12, 1.0, %v2604_v59  ;;  %v575_v49 = vrot.slane %v574_v57, 2  ;;  %v1474_v40 = vsel %vm626_vm13, 1.0, %v2604_v59  ;;  %v645_v43 = vadd.f32 %v1470_v44, %v1469_v27 }
  0x8c   :  { %v658_v55 = vmul.f32 %v2076_v1, %v1469_v27  ;;  %v594_v2 = vrot.slane %v593_v37, 4  ;;  %v613_v38 = vadd.f32 %v612_v45, %v606_v8  ;;  %v1475_v12 = vsel %vm627_vm14, 1.0, %v2604_v59  ;;  %v2094_v8 = vld [vmem:[#allocation2 + $0x20] sm:$0xff] }
  0x8d   :  { %v659_v42 = vmul.f32 %v2082_v3, %v1470_v44  ;;  %v576_v4 = vadd.f32 %v575_v49, %v574_v57  ;;  %v1476_v58 = vsel %vm628_vm15, 1.0, %v2604_v59  ;;  %v646_v50 = vadd.f32 %v1471_v5, %v645_v43 }
  0x8e   :  { %v660_v34 = vmul.f32 %v2088_v24, %v1471_v5  ;;  %v595_v31 = vadd.f32 %v594_v2, %v593_v37  ;;  %v614_v48 = vadd.f32 %v613_v38, %v607_v11  ;;  %v661_v6 = vmul.f32 %v2091_v20, %v1472_v22  ;;  %v2105_v37 = vld [vmem:[#allocation2 + $0x38] sm:$0xff] }
  0x8f   :  { %v662_v51 = vmul.f32 %v2094_v8, %v1473_v0  ;;  %v577_v61 = vrot.slane %v576_v4, 1  ;;  %v647_v39 = vadd.f32 %v1472_v22, %v646_v50  ;;  %v663_v7 = vmul.f32 %v2097_v23, %v1474_v40 }
  0x90   :  { %v666_v18 = vadd.f32 %v659_v42, %v658_v55  ;;  %v596_v28 = vrot.slane %v595_v31, 2  ;;  %v615_v41 = vrot.slane %v614_v48, 4  ;;  %v679_v53 = vmul.f32 %v1714_v9, %v1469_v27 }
  0x91   :  { %v680_v11 = vmul.f32 %v1716_v10, %v1470_v44  ;;  %v648_v62 = vadd.f32 %v1473_v0, %v647_v39  ;;  %v664_v57 = vmul.f32 %v2102_v54, %v1475_v12  ;;  %v665_v45 = vmul.f32 %v2105_v37, %v1476_v58 }
  0x92   :  { %v667_v49 = vadd.f32 %v666_v18, %v660_v34  ;;  %v2108_v43 = vadd.f32 %v577_v61, %v576_v4  ;;  %v597_v2 = vadd.f32 %v596_v28, %v595_v31  ;;  %v616_v55 = vadd.f32 %v615_v41, %v614_v48 }
  0x93   :  { %v681_v38 = vmul.f32 %v1720_v13, %v1471_v5  ;;  %v649_v42 = vadd.f32 %v1474_v40, %v648_v62  ;;  %v682_v44 = vmul.f32 %v1722_v14, %v1472_v22  ;;  %v683_v50 = vmul.f32 %v1726_v16, %v1473_v0 }
  0x94   :  { %v668_v27 = vadd.f32 %v667_v49, %v661_v6  ;;  %v598_v39 = vrot.slane %v597_v2, 1  ;;  %v617_v19 = vrot.slane %v616_v55, 2  ;;  %v684_v33 = vmul.f32 %v1728_v17, %v1474_v40 }
  0x95   :  { %v687_v47 = vadd.f32 %v680_v11, %v679_v53  ;;  %v650_v52 = vadd.f32 %v1475_v12, %v649_v42  ;;  %v685_v4 = vmul.f32 %v1744_v25, %v1475_v12  ;;  %v686_v34 = vmul.f32 %v1746_v26, %v1476_v58 }
  0x96   :  { %v669_v32 = vadd.f32 %v668_v27, %v662_v51  ;;  %v618_v31 = vadd.f32 %v617_v19, %v616_v55  ;;  %vm700_vm0 = vcmp.gt.f32.partialorder %v2076_v1, 0.53333336  ;;  %vm701_vm1 = vcmp.gt.f32.partialorder %v2082_v3, 0.53333336 }
  0x97   :  { %v688_v48 = vadd.f32 %v687_v47, %v681_v38  ;;  %v2118_v5 = vadd.f32 %v598_v39, %v597_v2  ;;  %v651_v22 = vadd.f32 %v1476_v58, %v650_v52  ;;  %vm702_vm2 = vcmp.gt.f32.partialorder %v2088_v24, 0.53333336 }
  0x98   :  { %v670_v0 = vadd.f32 %v669_v32, %v663_v7  ;;  %v619_v40 = vrot.slane %v618_v31, 1  ;;  %vm703_vm3 = vcmp.gt.f32.partialorder %v2091_v20, 0.53333336  ;;  %vm704_vm4 = vcmp.gt.f32.partialorder %v2094_v8, 0.53333336 }
  0x99   :  { %2606 = vst [vmem:[#allocation23_spill] sm:$0xff] %v2118_v5  ;;  %v689_v6 = vadd.f32 %v688_v48, %v682_v44  ;;  %v652_v12 = vrot.slane %v651_v22, 4  ;;  %vm705_vm5 = vcmp.gt.f32.partialorder %v2097_v23, 0.53333336  ;;  %vm706_vm6 = vcmp.gt.f32.partialorder %v2102_v54, 0.53333336 }
  0x9a   :  { %v671_v51 = vadd.f32 %v670_v0, %v664_v57  ;;  %v2125_v47 = vadd.f32 %v619_v40, %v618_v31  ;;  %vm707_vm7 = vcmp.gt.f32.partialorder %v2105_v37, 0.53333336  ;;  %v1477_v32 = vsel %vm700_vm0, 1.0, %v2604_v59 }
  0x9b   :  { %v690_v19 = vadd.f32 %v689_v6, %v683_v50  ;;  %v653_v52 = vadd.f32 %v652_v12, %v651_v22  ;;  %v1478_v61 = vsel %vm701_vm1, 1.0, %v2604_v59  ;;  %v1479_v7 = vsel %vm702_vm2, 1.0, %v2604_v59 }
  0x9c   :  { %2607 = vst [vmem:[#allocation24_spill] sm:$0xff] %v2125_v47  ;;  %v672_v58 = vadd.f32 %v671_v51, %v665_v45  ;;  %v1480_v28 = vsel %vm703_vm3, 1.0, %v2604_v59  ;;  %v1481_v41 = vsel %vm704_vm4, 1.0, %v2604_v59  ;;  %v1482_v53 = vsel %vm705_vm5, 1.0, %v2604_v59 }
  0x9d   :  { %v691_v18 = vadd.f32 %v690_v19, %v684_v33  ;;  %v654_v11 = vrot.slane %v653_v52, 2  ;;  %v724_v57 = vadd.f32 %v1478_v61, %v1477_v32  ;;  %v737_v45 = vmul.f32 %v2076_v1, %v1477_v32 }
  0x9e   :  { %v673_v62 = vrot.slane %v672_v58, 4  ;;  %v1483_v2 = vsel %vm706_vm6, 1.0, %v2604_v59  ;;  %v1484_v33 = vsel %vm707_vm7, 1.0, %v2604_v59  ;;  %v738_v55 = vmul.f32 %v2082_v3, %v1478_v61 }
  0x9f   :  { %v692_v49 = vadd.f32 %v691_v18, %v685_v4  ;;  %v655_v38 = vadd.f32 %v654_v11, %v653_v52  ;;  %v725_v27 = vadd.f32 %v1479_v7, %v724_v57  ;;  %v739_v44 = vmul.f32 %v2088_v24, %v1479_v7 }
  0xa0   :  { %v674_v42 = vadd.f32 %v673_v62, %v672_v58  ;;  %v740_v39 = vmul.f32 %v2091_v20, %v1480_v28  ;;  %v741_v4 = vmul.f32 %v2094_v8, %v1481_v41  ;;  %v742_v31 = vmul.f32 %v2097_v23, %v1482_v53 }
  0xa1   :  { %v693_v50 = vadd.f32 %v692_v49, %v686_v34  ;;  %v656_v48 = vrot.slane %v655_v38, 1  ;;  %v726_v0 = vadd.f32 %v1480_v28, %v725_v27  ;;  %v745_v40 = vadd.f32 %v738_v55, %v737_v45 }
  0xa2   :  { %v675_v22 = vrot.slane %v674_v42, 2  ;;  %v743_v12 = vmul.f32 %v2102_v54, %v1483_v2  ;;  %v758_v51 = vmul.f32 %v1714_v9, %v1477_v32  ;;  %v759_v19 = vmul.f32 %v1716_v10, %v1478_v61 }
  0xa3   :  { %v694_v6 = vrot.slane %v693_v50, 4  ;;  %v727_v58 = vadd.f32 %v1481_v41, %v726_v0  ;;  %v744_v34 = vmul.f32 %v2105_v37, %v1484_v33  ;;  %v746_v18 = vadd.f32 %v745_v40, %v739_v44 }
  0xa4   :  { %v676_v52 = vadd.f32 %v675_v22, %v674_v42  ;;  %v2156_v11 = vadd.f32 %v656_v48, %v655_v38  ;;  %v760_v57 = vmul.f32 %v1720_v13, %v1479_v7  ;;  %v761_v49 = vmul.f32 %v1722_v14, %v1480_v28 }
  0xa5   :  { %v695_v62 = vadd.f32 %v694_v6, %v693_v50  ;;  %v728_v55 = vadd.f32 %v1482_v53, %v727_v58  ;;  %v747_v27 = vadd.f32 %v746_v18, %v740_v39  ;;  %v762_v47 = vmul.f32 %v1726_v16, %v1481_v41 }
  0xa6   :  { %v677_v45 = vrot.slane %v676_v52, 1  ;;  %v763_v61 = vmul.f32 %v1728_v17, %v1482_v53  ;;  %v764_v42 = vmul.f32 %v1744_v25, %v1483_v2  ;;  %v766_v22 = vadd.f32 %v759_v19, %v758_v51 }
  0xa7   :  { %v696_v32 = vrot.slane %v695_v62, 2  ;;  %v729_v0 = vadd.f32 %v1483_v2, %v728_v55  ;;  %v748_v44 = vadd.f32 %v747_v27, %v741_v4  ;;  %v765_v38 = vmul.f32 %v1746_v26, %v1484_v33 }
  0xa8   :  { %vm779_vm8 = vcmp.gt.f32.partialorder %v2076_v1, 0.6  ;;  %v2165_v7 = vadd.f32 %v677_v45, %v676_v52  ;;  %v767_v50 = vadd.f32 %v766_v22, %v760_v57  ;;  %vm780_vm9 = vcmp.gt.f32.partialorder %v2082_v3, 0.6 }
  0xa9   :  { %v697_v28 = vadd.f32 %v696_v32, %v695_v62  ;;  %v730_v39 = vadd.f32 %v1484_v33, %v729_v0  ;;  %v749_v41 = vadd.f32 %v748_v44, %v742_v31  ;;  %vm781_vm10 = vcmp.gt.f32.partialorder %v2088_v24, 0.6 }
  0xaa   :  { %2608 = vst [vmem:[#allocation25_spill] sm:$0xff] %v2165_v7  ;;  %vm782_vm11 = vcmp.gt.f32.partialorder %v2091_v20, 0.6  ;;  %v768_v48 = vadd.f32 %v767_v50, %v761_v49  ;;  %vm783_vm12 = vcmp.gt.f32.partialorder %v2094_v8, 0.6  ;;  %v1485_v31 = vsel %vm779_vm8, 1.0, %v2604_v59 }
  0xab   :  { %v698_v53 = vrot.slane %v697_v28, 1  ;;  %vm784_vm13 = vcmp.gt.f32.partialorder %v2097_v23, 0.6  ;;  %v731_v2 = vrot.slane %v730_v39, 4  ;;  %v750_v4 = vadd.f32 %v749_v41, %v743_v12 }
  0xac   :  { %vm785_vm14 = vcmp.gt.f32.partialorder %v2102_v54, 0.6  ;;  %vm786_vm15 = vcmp.gt.f32.partialorder %v2105_v37, 0.6  ;;  %v769_v33 = vadd.f32 %v768_v48, %v762_v47  ;;  %v1486_v6 = vsel %vm780_vm9, 1.0, %v2604_v59 }
  0xad   :  { %v2174_v40 = vadd.f32 %v698_v53, %v697_v28  ;;  %v732_v51 = vadd.f32 %v731_v2, %v730_v39  ;;  %v751_v19 = vadd.f32 %v750_v4, %v744_v34  ;;  %v1487_v12 = vsel %vm781_vm10, 1.0, %v2604_v59 }
  0xae   :  { %v1488_v52 = vsel %vm782_vm11, 1.0, %v2604_v59  ;;  %v770_v58 = vadd.f32 %v769_v33, %v763_v61  ;;  %v1489_v47 = vsel %vm783_vm12, 1.0, %v2604_v59  ;;  %v1490_v18 = vsel %vm784_vm13, 1.0, %v2604_v59 }
  0xaf   :  { %2609 = vst [vmem:[#allocation26_spill] sm:$0xff] %v2174_v40  ;;  %v803_v62 = vadd.f32 %v1486_v6, %v1485_v31  ;;  %v733_v57 = vrot.slane %v732_v51, 2  ;;  %v752_v49 = vrot.slane %v751_v19, 4  ;;  %v816_v45 = vmul.f32 %v2076_v1, %v1485_v31 }
  0xb0   :  { %v817_v34 = vmul.f32 %v2082_v3, %v1486_v6  ;;  %v771_v55 = vadd.f32 %v770_v58, %v764_v42  ;;  %v1491_v27 = vsel %vm785_vm14, 1.0, %v2604_v59  ;;  %v1492_v32 = vsel %vm786_vm15, 1.0, %v2604_v59 }
  0xb1   :  { %v804_v61 = vadd.f32 %v1487_v12, %v803_v62  ;;  %v734_v22 = vadd.f32 %v733_v57, %v732_v51  ;;  %v753_v0 = vadd.f32 %v752_v49, %v751_v19  ;;  %v818_v44 = vmul.f32 %v2088_v24, %v1487_v12 }
  0xb2   :  { %v819_v28 = vmul.f32 %v2091_v20, %v1488_v52  ;;  %v772_v50 = vadd.f32 %v771_v55, %v765_v38  ;;  %v820_v41 = vmul.f32 %v2094_v8, %v1489_v47  ;;  %v821_v42 = vmul.f32 %v2097_v23, %v1490_v18 }
  0xb3   :  { %v805_v39 = vadd.f32 %v1488_v52, %v804_v61  ;;  %v735_v53 = vrot.slane %v734_v22, 1  ;;  %v754_v48 = vrot.slane %v753_v0, 2  ;;  %v822_v2 = vmul.f32 %v2102_v54, %v1491_v27 }
  0xb4   :  { %v824_v4 = vadd.f32 %v817_v34, %v816_v45  ;;  %v773_v33 = vrot.slane %v772_v50, 4  ;;  %v837_v51 = vmul.f32 %v1714_v9, %v1485_v31  ;;  %v838_v19 = vmul.f32 %v1716_v10, %v1486_v6 }
  0xb5   :  { %v806_v58 = vadd.f32 %v1489_v47, %v805_v39  ;;  %v755_v62 = vadd.f32 %v754_v48, %v753_v0  ;;  %v823_v57 = vmul.f32 %v2105_v37, %v1492_v32  ;;  %v839_v49 = vmul.f32 %v1720_v13, %v1487_v12 }
  0xb6   :  { %v825_v38 = vadd.f32 %v824_v4, %v818_v44  ;;  %v2207_v55 = vadd.f32 %v735_v53, %v734_v22  ;;  %v774_v61 = vadd.f32 %v773_v33, %v772_v50  ;;  %v840_v7 = vmul.f32 %v1722_v14, %v1488_v52 }
  0xb7   :  { %v807_v40 = vadd.f32 %v1490_v18, %v806_v58  ;;  %v756_v5 = vrot.slane %v755_v62, 1  ;;  %v841_v34 = vmul.f32 %v1726_v16, %v1489_v47  ;;  %v842_v31 = vmul.f32 %v1728_v17, %v1490_v18 }
  0xb8   :  { %v826_v45 = vadd.f32 %v825_v38, %v819_v28  ;;  %v775_v39 = vrot.slane %v774_v61, 2  ;;  %v843_v0 = vmul.f32 %v1744_v25, %v1491_v27  ;;  %v845_v48 = vadd.f32 %v838_v19, %v837_v51 }
  0xb9   :  { %v808_v6 = vadd.f32 %v1491_v27, %v807_v40  ;;  %v2213_v44 = vadd.f32 %v756_v5, %v755_v62  ;;  %v844_v22 = vmul.f32 %v1746_v26, %v1492_v32  ;;  %vm858_vm0 = vcmp.gt.f32.partialorder %v2076_v1, 0.6666667 }
  0xba   :  { %v827_v12 = vadd.f32 %v826_v45, %v820_v41  ;;  %v776_v50 = vadd.f32 %v775_v39, %v774_v61  ;;  %v846_v53 = vadd.f32 %v845_v48, %v839_v49  ;;  %vm859_vm1 = vcmp.gt.f32.partialorder %v2082_v3, 0.6666667 }
  0xbb   :  { %2610 = vst [vmem:[#allocation27_spill] sm:$0xff] %v2213_v44  ;;  %v809_v52 = vadd.f32 %v1492_v32, %v808_v6  ;;  %vm860_vm2 = vcmp.gt.f32.partialorder %v2088_v24, 0.6666667  ;;  %vm861_vm3 = vcmp.gt.f32.partialorder %v2091_v20, 0.6666667  ;;  %v1493_v32 = vsel %vm858_vm0, 1.0, %v2604_v59 }
  0xbc   :  { %v828_v47 = vadd.f32 %v827_v12, %v821_v42  ;;  %vm862_vm4 = vcmp.gt.f32.partialorder %v2094_v8, 0.6666667  ;;  %v777_v40 = vrot.slane %v776_v50, 1  ;;  %v847_v18 = vadd.f32 %v846_v53, %v840_v7 }
  0xbd   :  { %v810_v5 = vrot.slane %v809_v52, 4  ;;  %vm863_vm5 = vcmp.gt.f32.partialorder %v2097_v23, 0.6666667  ;;  %vm864_vm6 = vcmp.gt.f32.partialorder %v2102_v54, 0.6666667  ;;  %v1494_v42 = vsel %vm859_vm1, 1.0, %v2604_v59 }
  0xbe   :  { %v829_v27 = vadd.f32 %v828_v47, %v822_v2  ;;  %vm865_vm7 = vcmp.gt.f32.partialorder %v2105_v37, 0.6666667  ;;  %v848_v41 = vadd.f32 %v847_v18, %v841_v34  ;;  %v1495_v4 = vsel %vm860_vm2, 1.0, %v2604_v59 }
  0xbf   :  { %v811_v28 = vadd.f32 %v810_v5, %v809_v52  ;;  %v2229_v33 = vadd.f32 %v777_v40, %v776_v50  ;;  %v1496_v2 = vsel %vm861_vm3, 1.0, %v2604_v59  ;;  %v1497_v58 = vsel %vm862_vm4, 1.0, %v2604_v59 }
  0xc0   :  { %v830_v7 = vadd.f32 %v829_v27, %v823_v57  ;;  %v849_v19 = vadd.f32 %v848_v41, %v842_v31  ;;  %v1498_v62 = vsel %vm863_vm5, 1.0, %v2604_v59  ;;  %v882_v38 = vadd.f32 %v1494_v42, %v1493_v32 }
  0xc1   :  { %2611 = vst [vmem:[#allocation28_spill] sm:$0xff] %v2229_v33  ;;  %v812_v51 = vrot.slane %v811_v28, 2  ;;  %v1499_v61 = vsel %vm864_vm6, 1.0, %v2604_v59  ;;  %v895_v57 = vmul.f32 %v2076_v1, %v1493_v32  ;;  %v896_v45 = vmul.f32 %v2082_v3, %v1494_v42 }
  0xc2   :  { %v831_v49 = vrot.slane %v830_v7, 4  ;;  %v850_v39 = vadd.f32 %v849_v19, %v843_v0  ;;  %v1500_v6 = vsel %vm865_vm7, 1.0, %v2604_v59  ;;  %v883_v48 = vadd.f32 %v1495_v4, %v882_v38 }
  0xc3   :  { %v813_v34 = vadd.f32 %v812_v51, %v811_v28  ;;  %v897_v12 = vmul.f32 %v2088_v24, %v1495_v4  ;;  %v898_v50 = vmul.f32 %v2091_v20, %v1496_v2  ;;  %v899_v52 = vmul.f32 %v2094_v8, %v1497_v58 }
  0xc4   :  { %v832_v31 = vadd.f32 %v831_v49, %v830_v7  ;;  %v851_v47 = vadd.f32 %v850_v39, %v844_v22  ;;  %v884_v40 = vadd.f32 %v1496_v2, %v883_v48  ;;  %v900_v5 = vmul.f32 %v2097_v23, %v1498_v62 }
  0xc5   :  { %v814_v53 = vrot.slane %v813_v34, 1  ;;  %v903_v27 = vadd.f32 %v896_v45, %v895_v57  ;;  %v916_v0 = vmul.f32 %v1714_v9, %v1493_v32  ;;  %v917_v28 = vmul.f32 %v1716_v10, %v1494_v42 }
  0xc6   :  { %v833_v18 = vrot.slane %v832_v31, 2  ;;  %v852_v41 = vrot.slane %v851_v47, 4  ;;  %v885_v51 = vadd.f32 %v1497_v58, %v884_v40  ;;  %v901_v7 = vmul.f32 %v2102_v54, %v1499_v61 }
  0xc7   :  { %v902_v19 = vmul.f32 %v2105_v37, %v1500_v6  ;;  %v2254_v38 = vadd.f32 %v814_v53, %v813_v34  ;;  %v904_v33 = vadd.f32 %v903_v27, %v897_v12  ;;  %v918_v22 = vmul.f32 %v1720_v13, %v1495_v4 }
  0xc8   :  { %v834_v49 = vadd.f32 %v833_v18, %v832_v31  ;;  %v853_v39 = vadd.f32 %v852_v41, %v851_v47  ;;  %v886_v48 = vadd.f32 %v1498_v62, %v885_v51  ;;  %v919_v57 = vmul.f32 %v1722_v14, %v1496_v2 }
  0xc9   :  { %v920_v32 = vmul.f32 %v1726_v16, %v1497_v58  ;;  %v905_v42 = vadd.f32 %v904_v33, %v898_v50  ;;  %v921_v40 = vmul.f32 %v1728_v17, %v1498_v62  ;;  %v924_v44 = vadd.f32 %v917_v28, %v916_v0 }
  0xca   :  { %v835_v45 = vrot.slane %v834_v49, 1  ;;  %v854_v36 = vrot.slane %v853_v39, 2  ;;  %v887_v56 = vadd.f32 %v1499_v61, %v886_v48  ;;  %v922_v34 = vmul.f32 %v1744_v25, %v1499_v61 }
  0xcb   :  { %v923_v31 = vmul.f32 %v1746_v26, %v1500_v6  ;;  %v906_v12 = vadd.f32 %v905_v42, %v899_v52  ;;  %v925_v53 = vadd.f32 %v924_v44, %v918_v22  ;;  %vm937_vm8 = vcmp.gt.f32.partialorder %v2076_v1, 0.73333335 }
  0xcc   :  { %vm938_vm9 = vcmp.gt.f32.partialorder %v2082_v3, 0.73333335  ;;  %v2264_v4 = vadd.f32 %v835_v45, %v834_v49  ;;  %v855_v2 = vadd.f32 %v854_v36, %v853_v39  ;;  %v888_v58 = vadd.f32 %v1500_v6, %v887_v56 }
  0xcd   :  { %vm939_vm10 = vcmp.gt.f32.partialorder %v2088_v24, 0.73333335  ;;  %v907_v33 = vadd.f32 %v906_v12, %v900_v5  ;;  %v926_v62 = vadd.f32 %v925_v53, %v919_v57  ;;  %vm940_vm11 = vcmp.gt.f32.partialorder %v2091_v20, 0.73333335 }
  0xce   :  { %2612 = vst [vmem:[#allocation29_spill] sm:$0xff] %v2264_v4  ;;  %vm941_vm12 = vcmp.gt.f32.partialorder %v2094_v8, 0.73333335  ;;  %v856_v61 = vrot.slane %v855_v2, 1  ;;  %v889_v50 = vrot.slane %v888_v58, 4  ;;  %v1501_v56 = vsel %vm937_vm8, 1.0, %v2604_v59 }
  0xcf   :  { %vm942_vm13 = vcmp.gt.f32.partialorder %v2097_v23, 0.73333335  ;;  %vm943_vm14 = vcmp.gt.f32.partialorder %v2102_v54, 0.73333335  ;;  %v908_v44 = vadd.f32 %v907_v33, %v901_v7  ;;  %v927_v52 = vadd.f32 %v926_v62, %v920_v32 }
  0xd0   :  { %vm944_vm15 = vcmp.gt.f32.partialorder %v2105_v37, 0.73333335  ;;  %v2275_v36 = vadd.f32 %v856_v61, %v855_v2  ;;  %v890_v6 = vadd.f32 %v889_v50, %v888_v58  ;;  %v1502_v47 = vsel %vm938_vm9, 1.0, %v2604_v59 }
  0xd1   :  { %v1503_v5 = vsel %vm939_vm10, 1.0, %v2604_v59  ;;  %v909_v18 = vadd.f32 %v908_v44, %v902_v19  ;;  %v928_v27 = vadd.f32 %v927_v52, %v921_v40  ;;  %v1504_v0 = vsel %vm940_vm11, 1.0, %v2604_v59 }
  0xd2   :  { %2613 = vst [vmem:[#allocation30_spill] sm:$0xff] %v2275_v36  ;;  %v1505_v28 = vsel %vm941_vm12, 1.0, %v2604_v59  ;;  %v891_v41 = vrot.slane %v890_v6, 2  ;;  %v1506_v51 = vsel %vm942_vm13, 1.0, %v2604_v59  ;;  %v961_v7 = vadd.f32 %v1502_v47, %v1501_v56 }
  0xd3   :  { %v974_v49 = vmul.f32 %v2076_v1, %v1501_v56  ;;  %v910_v22 = vrot.slane %v909_v18, 4  ;;  %v929_v39 = vadd.f32 %v928_v27, %v922_v34  ;;  %v1507_v19 = vsel %vm943_vm14, 1.0, %v2604_v59 }
  0xd4   :  { %v975_v48 = vmul.f32 %v2082_v3, %v1502_v47  ;;  %v892_v57 = vadd.f32 %v891_v41, %v890_v6  ;;  %v1508_v32 = vsel %vm944_vm15, 1.0, %v2604_v59  ;;  %v962_v45 = vadd.f32 %v1503_v5, %v961_v7 }
  0xd5   :  { %v976_v42 = vmul.f32 %v2088_v24, %v1503_v5  ;;  %v911_v40 = vadd.f32 %v910_v22, %v909_v18  ;;  %v930_v12 = vadd.f32 %v929_v39, %v923_v31  ;;  %v977_v53 = vmul.f32 %v2091_v20, %v1504_v0 }
  0xd6   :  { %v978_v34 = vmul.f32 %v2094_v8, %v1505_v28  ;;  %v893_v2 = vrot.slane %v892_v57, 1  ;;  %v963_v58 = vadd.f32 %v1504_v0, %v962_v45  ;;  %v979_v33 = vmul.f32 %v2097_v23, %v1506_v51 }
  0xd7   :  { %v982_v62 = vadd.f32 %v975_v48, %v974_v49  ;;  %v912_v61 = vrot.slane %v911_v40, 2  ;;  %v931_v50 = vrot.slane %v930_v12, 4  ;;  %v995_v44 = vmul.f32 %v1714_v9, %v1501_v56 }
  0xd8   :  { %v996_v52 = vmul.f32 %v1716_v10, %v1502_v47  ;;  %v964_v6 = vadd.f32 %v1505_v28, %v963_v58  ;;  %v980_v27 = vmul.f32 %v2102_v54, %v1507_v19  ;;  %v981_v31 = vmul.f32 %v2105_v37, %v1508_v32 }
  0xd9   :  { %v983_v18 = vadd.f32 %v982_v62, %v976_v42  ;;  %v2306_v41 = vadd.f32 %v893_v2, %v892_v57  ;;  %v913_v7 = vadd.f32 %v912_v61, %v911_v40  ;;  %v932_v22 = vadd.f32 %v931_v50, %v930_v12 }
  0xda   :  { %v997_v39 = vmul.f32 %v1720_v13, %v1503_v5  ;;  %v965_v45 = vadd.f32 %v1506_v51, %v964_v6  ;;  %v998_v48 = vmul.f32 %v1722_v14, %v1504_v0  ;;  %v999_v56 = vmul.f32 %v1726_v16, %v1505_v28 }
  0xdb   :  { %v984_v49 = vadd.f32 %v983_v18, %v977_v53  ;;  %v914_v36 = vrot.slane %v913_v7, 1  ;;  %v933_v47 = vrot.slane %v932_v22, 2  ;;  %v1000_v58 = vmul.f32 %v1728_v17, %v1506_v51 }
  0xdc   :  { %v1003_v4 = vadd.f32 %v996_v52, %v995_v44  ;;  %v966_v30 = vadd.f32 %v1507_v19, %v965_v45  ;;  %v1001_v57 = vmul.f32 %v1744_v25, %v1507_v19  ;;  %v1002_v42 = vmul.f32 %v1746_v26, %v1508_v32 }
  0xdd   :  { %v985_v35 = vadd.f32 %v984_v49, %v978_v34  ;;  %v934_v40 = vadd.f32 %v933_v47, %v932_v22  ;;  %vm1016_vm0 = vcmp.gt.f32.partialorder %v2076_v1, 0.8  ;;  %vm1017_vm1 = vcmp.gt.f32.partialorder %v2082_v3, 0.8 }
  0xde   :  { %v1004_v12 = vadd.f32 %v1003_v4, %v997_v39  ;;  %v2316_v5 = vadd.f32 %v914_v36, %v913_v7  ;;  %v967_v0 = vadd.f32 %v1508_v32, %v966_v30  ;;  %vm1018_vm2 = vcmp.gt.f32.partialorder %v2088_v24, 0.8 }
  0xdf   :  { %v986_v28 = vadd.f32 %v985_v35, %v979_v33  ;;  %v935_v51 = vrot.slane %v934_v40, 1  ;;  %vm1019_vm3 = vcmp.gt.f32.partialorder %v2091_v20, 0.8  ;;  %vm1020_vm4 = vcmp.gt.f32.partialorder %v2094_v8, 0.8 }
  0xe0   :  { %2614 = vst [vmem:[#allocation31_spill] sm:$0xff] %v2316_v5  ;;  %v1005_v53 = vadd.f32 %v1004_v12, %v998_v48  ;;  %v968_v19 = vrot.slane %v967_v0, 4  ;;  %vm1021_vm5 = vcmp.gt.f32.partialorder %v2097_v23, 0.8  ;;  %vm1022_vm6 = vcmp.gt.f32.partialorder %v2102_v54, 0.8 }
  0xe1   :  { %v987_v34 = vadd.f32 %v986_v28, %v980_v27  ;;  %v2323_v4 = vadd.f32 %v935_v51, %v934_v40  ;;  %vm1023_vm7 = vcmp.gt.f32.partialorder %v2105_v37, 0.8  ;;  %v1509_v30 = vsel %vm1016_vm0, 1.0, %v2604_v59 }
  0xe2   :  { %v1006_v36 = vadd.f32 %v1005_v53, %v999_v56  ;;  %v969_v35 = vadd.f32 %v968_v19, %v967_v0  ;;  %v1510_v2 = vsel %vm1017_vm1, 1.0, %v2604_v59  ;;  %v1511_v33 = vsel %vm1018_vm2, 1.0, %v2604_v59 }
  0xe3   :  { %2615 = vst [vmem:[#allocation32_spill] sm:$0xff] %v2323_v4  ;;  %v988_v32 = vadd.f32 %v987_v34, %v981_v31  ;;  %v1512_v61 = vsel %vm1019_vm3, 1.0, %v2604_v59  ;;  %v1513_v50 = vsel %vm1020_vm4, 1.0, %v2604_v59  ;;  %v1514_v44 = vsel %vm1021_vm5, 1.0, %v2604_v59 }
  0xe4   :  { %v1007_v62 = vadd.f32 %v1006_v36, %v1000_v58  ;;  %v970_v52 = vrot.slane %v969_v35, 2  ;;  %v1040_v27 = vadd.f32 %v1510_v2, %v1509_v30  ;;  %v1053_v31 = vmul.f32 %v2076_v1, %v1509_v30 }
  0xe5   :  { %v989_v6 = vrot.slane %v988_v32, 4  ;;  %v1515_v7 = vsel %vm1022_vm6, 1.0, %v2604_v59  ;;  %v1516_v22 = vsel %vm1023_vm7, 1.0, %v2604_v59  ;;  %v1054_v39 = vmul.f32 %v2082_v3, %v1510_v2 }
  0xe6   :  { %v1008_v18 = vadd.f32 %v1007_v62, %v1001_v57  ;;  %v971_v45 = vadd.f32 %v970_v52, %v969_v35  ;;  %v1041_v48 = vadd.f32 %v1511_v33, %v1040_v27  ;;  %v1055_v56 = vmul.f32 %v2088_v24, %v1511_v33 }
  0xe7   :  { %v990_v49 = vadd.f32 %v989_v6, %v988_v32  ;;  %v1056_v58 = vmul.f32 %v2091_v20, %v1512_v61  ;;  %v1057_v57 = vmul.f32 %v2094_v8, %v1513_v50  ;;  %v1058_v40 = vmul.f32 %v2097_v23, %v1514_v44 }
  0xe8   :  { %v1009_v47 = vadd.f32 %v1008_v18, %v1002_v42  ;;  %v972_v12 = vrot.slane %v971_v45, 1  ;;  %v1042_v28 = vadd.f32 %v1512_v61, %v1041_v48  ;;  %v1061_v51 = vadd.f32 %v1054_v39, %v1053_v31 }
  0xe9   :  { %v991_v0 = vrot.slane %v990_v49, 2  ;;  %v1059_v19 = vmul.f32 %v2102_v54, %v1515_v7  ;;  %v1074_v34 = vmul.f32 %v1714_v9, %v1509_v30  ;;  %v1075_v36 = vmul.f32 %v1716_v10, %v1510_v2 }
  0xea   :  { %v1010_v53 = vrot.slane %v1009_v47, 4  ;;  %v1043_v32 = vadd.f32 %v1513_v50, %v1042_v28  ;;  %v1060_v42 = vmul.f32 %v2105_v37, %v1516_v22  ;;  %v1062_v62 = vadd.f32 %v1061_v51, %v1055_v56 }
  0xeb   :  { %v992_v35 = vadd.f32 %v991_v0, %v990_v49  ;;  %v2354_v52 = vadd.f32 %v972_v12, %v971_v45  ;;  %v1076_v27 = vmul.f32 %v1720_v13, %v1511_v33  ;;  %v1077_v18 = vmul.f32 %v1722_v14, %v1512_v61 }
  0xec   :  { %v1011_v6 = vadd.f32 %v1010_v53, %v1009_v47  ;;  %v1044_v39 = vadd.f32 %v1514_v44, %v1043_v32  ;;  %v1063_v48 = vadd.f32 %v1062_v62, %v1056_v58  ;;  %v1078_v4 = vmul.f32 %v1726_v16, %v1513_v50 }
  0xed   :  { %v993_v31 = vrot.slane %v992_v35, 1  ;;  %v1079_v2 = vmul.f32 %v1728_v17, %v1514_v44  ;;  %v1080_v49 = vmul.f32 %v1744_v25, %v1515_v7  ;;  %v1082_v0 = vadd.f32 %v1075_v36, %v1074_v34 }
  0xee   :  { %v1012_v30 = vrot.slane %v1011_v6, 2  ;;  %v1045_v28 = vadd.f32 %v1515_v7, %v1044_v39  ;;  %v1064_v56 = vadd.f32 %v1063_v48, %v1057_v57  ;;  %v1081_v45 = vmul.f32 %v1746_v26, %v1516_v22 }
  0xef   :  { %vm1095_vm8 = vcmp.gt.f32.partialorder %v2076_v1, 0.8666667  ;;  %v2363_v33 = vadd.f32 %v993_v31, %v992_v35  ;;  %v1083_v47 = vadd.f32 %v1082_v0, %v1076_v27  ;;  %vm1096_vm9 = vcmp.gt.f32.partialorder %v2082_v3, 0.8666667 }
  0xf0   :  { %v1013_v61 = vadd.f32 %v1012_v30, %v1011_v6  ;;  %v1046_v58 = vadd.f32 %v1516_v22, %v1045_v28  ;;  %v1065_v50 = vadd.f32 %v1064_v56, %v1058_v40  ;;  %vm1097_vm10 = vcmp.gt.f32.partialorder %v2088_v24, 0.8666667 }
  0xf1   :  { %2616 = vst [vmem:[#allocation33_spill] sm:$0xff] %v2363_v33  ;;  %vm1098_vm11 = vcmp.gt.f32.partialorder %v2091_v20, 0.8666667  ;;  %v1084_v12 = vadd.f32 %v1083_v47, %v1077_v18  ;;  %vm1099_vm12 = vcmp.gt.f32.partialorder %v2094_v8, 0.8666667  ;;  %v1517_v40 = vsel %vm1095_vm8, 1.0, %v2604_v59 }
  0xf2   :  { %v1014_v44 = vrot.slane %v1013_v61, 1  ;;  %vm1100_vm13 = vcmp.gt.f32.partialorder %v2097_v23, 0.8666667  ;;  %v1047_v7 = vrot.slane %v1046_v58, 4  ;;  %v1066_v57 = vadd.f32 %v1065_v50, %v1059_v19 }
  0xf3   :  { %vm1101_vm14 = vcmp.gt.f32.partialorder %v2102_v54, 0.8666667  ;;  %vm1102_vm15 = vcmp.gt.f32.partialorder %v2105_v37, 0.8666667  ;;  %v1085_v22 = vadd.f32 %v1084_v12, %v1078_v4  ;;  %v1518_v53 = vsel %vm1096_vm9, 1.0, %v2604_v59 }
  0xf4   :  { %v2372_v51 = vadd.f32 %v1014_v44, %v1013_v61  ;;  %v1048_v34 = vadd.f32 %v1047_v7, %v1046_v58  ;;  %v1067_v36 = vadd.f32 %v1066_v57, %v1060_v42  ;;  %v1519_v19 = vsel %vm1097_vm10, 1.0, %v2604_v59 }
  0xf5   :  { %v1520_v35 = vsel %vm1098_vm11, 1.0, %v2604_v59  ;;  %v1086_v32 = vadd.f32 %v1085_v22, %v1079_v2  ;;  %v1521_v4 = vsel %vm1099_vm12, 1.0, %v2604_v59  ;;  %v1522_v62 = vsel %vm1100_vm13, 1.0, %v2604_v59 }
  0xf6   :  { %2617 = vst [vmem:[#allocation34_spill] sm:$0xff] %v2372_v51  ;;  %v1119_v6 = vadd.f32 %v1518_v53, %v1517_v40  ;;  %v1049_v27 = vrot.slane %v1048_v34, 2  ;;  %v1068_v18 = vrot.slane %v1067_v36, 4  ;;  %v1132_v31 = vmul.f32 %v2076_v1, %v1517_v40 }
  0xf7   :  { %v1133_v42 = vmul.f32 %v2082_v3, %v1518_v53  ;;  %v1087_v39 = vadd.f32 %v1086_v32, %v1080_v49  ;;  %v1523_v48 = vsel %vm1101_vm14, 1.0, %v2604_v59  ;;  %v1524_v30 = vsel %vm1102_vm15, 1.0, %v2604_v59 }
  0xf8   :  { %v1120_v2 = vadd.f32 %v1519_v19, %v1119_v6  ;;  %v1050_v0 = vadd.f32 %v1049_v27, %v1048_v34  ;;  %v1069_v28 = vadd.f32 %v1068_v18, %v1067_v36  ;;  %v1134_v56 = vmul.f32 %v2088_v24, %v1519_v19 }
  0xf9   :  { %v1135_v61 = vmul.f32 %v2091_v20, %v1520_v35  ;;  %v1088_v47 = vadd.f32 %v1087_v39, %v1081_v45  ;;  %v1136_v50 = vmul.f32 %v2094_v8, %v1521_v4  ;;  %v1137_v49 = vmul.f32 %v2097_v23, %v1522_v62 }
  0xfa   :  { %v1121_v58 = vadd.f32 %v1520_v35, %v1120_v2  ;;  %v1051_v44 = vrot.slane %v1050_v0, 1  ;;  %v1070_v12 = vrot.slane %v1069_v28, 2  ;;  %v1138_v7 = vmul.f32 %v2102_v54, %v1523_v48 }
  0xfb   :  { %v1140_v57 = vadd.f32 %v1133_v42, %v1132_v31  ;;  %v1089_v22 = vrot.slane %v1088_v47, 4  ;;  %v1153_v34 = vmul.f32 %v1714_v9, %v1517_v40  ;;  %v1154_v36 = vmul.f32 %v1716_v10, %v1518_v53 }
  0xfc   :  { %v1122_v32 = vadd.f32 %v1521_v4, %v1121_v58  ;;  %v1071_v6 = vadd.f32 %v1070_v12, %v1069_v28  ;;  %v1139_v27 = vmul.f32 %v2105_v37, %v1524_v30  ;;  %v1155_v18 = vmul.f32 %v1720_v13, %v1519_v19 }
  0xfd   :  { %v1141_v45 = vadd.f32 %v1140_v57, %v1134_v56  ;;  %v2405_v39 = vadd.f32 %v1051_v44, %v1050_v0  ;;  %v1090_v2 = vadd.f32 %v1089_v22, %v1088_v47  ;;  %v1156_v33 = vmul.f32 %v1722_v14, %v1520_v35 }
  0xfe   :  { %v1123_v51 = vadd.f32 %v1522_v62, %v1122_v32  ;;  %v1072_v5 = vrot.slane %v1071_v6, 1  ;;  %v1157_v42 = vmul.f32 %v1726_v16, %v1521_v4  ;;  %v1158_v40 = vmul.f32 %v1728_v17, %v1522_v62 }
  0xff   :  { %v1142_v31 = vadd.f32 %v1141_v45, %v1135_v61  ;;  %v1091_v58 = vrot.slane %v1090_v2, 2  ;;  %v1159_v28 = vmul.f32 %v1744_v25, %v1523_v48  ;;  %v1161_v12 = vadd.f32 %v1154_v36, %v1153_v34 }
 0x100   :  { %v1124_v53 = vadd.f32 %v1523_v48, %v1123_v51  ;;  %v2411_v56 = vadd.f32 %v1072_v5, %v1071_v6  ;;  %v1160_v0 = vmul.f32 %v1746_v26, %v1524_v30  ;;  %vm1174_vm0 = vcmp.gt.f32.partialorder %v2076_v1, 0.93333334 }
 0x101   :  { %v1143_v19 = vadd.f32 %v1142_v31, %v1136_v50  ;;  %v1092_v47 = vadd.f32 %v1091_v58, %v1090_v2  ;;  %v1162_v44 = vadd.f32 %v1161_v12, %v1155_v18  ;;  %vm1175_vm1 = vcmp.gt.f32.partialorder %v2082_v3, 0.93333334 }
 0x102   :  { %v1125_v35 = vadd.f32 %v1524_v30, %v1124_v53  ;;  %vm1176_vm2 = vcmp.gt.f32.partialorder %v2088_v24, 0.93333334  ;;  %vm1177_vm3 = vcmp.gt.f32.partialorder %v2091_v20, 0.93333334  ;;  %vm1178_vm4 = vcmp.gt.f32.partialorder %v2094_v8, 0.93333334 }
 0x103   :  { %v1144_v4 = vadd.f32 %v1143_v19, %v1137_v49  ;;  %v1093_v51 = vrot.slane %v1092_v47, 1  ;;  %v1163_v62 = vadd.f32 %v1162_v44, %v1156_v33  ;;  %vm1179_vm5 = vcmp.gt.f32.partialorder %v2097_v23, 0.93333334 }
 0x104   :  { %v1126_v5 = vrot.slane %v1125_v35, 4  ;;  %vm1180_vm6 = vcmp.gt.f32.partialorder %v2102_v54, 0.93333334  ;;  %vm1181_vm7 = vcmp.gt.f32.partialorder %v2105_v37, 0.93333334  ;;  %v1525_v30 = vsel %vm1174_vm0, 1.0, %v2604_v59 }
 0x105   :  { %v1145_v48 = vadd.f32 %v1144_v4, %v1138_v7  ;;  %v1164_v50 = vadd.f32 %v1163_v62, %v1157_v42  ;;  %v1526_v49 = vsel %vm1175_vm1, 1.0, %v2604_v59  ;;  %v1527_v57 = vsel %vm1176_vm2, 1.0, %v2604_v59 }
 0x106   :  { %v1127_v61 = vadd.f32 %v1126_v5, %v1125_v35  ;;  %v2427_v22 = vadd.f32 %v1093_v51, %v1092_v47  ;;  %v1528_v7 = vsel %vm1177_vm3, 1.0, %v2604_v59  ;;  %v1529_v32 = vsel %vm1178_vm4, 1.0, %v2604_v59 }
 0x107   :  { %v1146_v33 = vadd.f32 %v1145_v48, %v1139_v27  ;;  %v1165_v36 = vadd.f32 %v1164_v50, %v1158_v40  ;;  %v1530_v6 = vsel %vm1179_vm5, 1.0, %v2604_v59  ;;  %v1198_v45 = vadd.f32 %v1526_v49, %v1525_v30 }
 0x108   :  { %2618 = vst [vmem:[#allocation35_spill] sm:$0xff] %v2427_v22  ;;  %v1128_v34 = vrot.slane %v1127_v61, 2  ;;  %v1531_v2 = vsel %vm1180_vm6, 1.0, %v2604_v59  ;;  %v1211_v27 = vmul.f32 %v2076_v1, %v1525_v30  ;;  %v1212_v31 = vmul.f32 %v2082_v3, %v1526_v49 }
 0x109   :  { %v1147_v18 = vrot.slane %v1146_v33, 4  ;;  %v1166_v58 = vadd.f32 %v1165_v36, %v1159_v28  ;;  %v1532_v53 = vsel %vm1181_vm7, 1.0, %v2604_v59  ;;  %v1199_v12 = vadd.f32 %v1527_v57, %v1198_v45 }
 0x10a   :  { %v1129_v42 = vadd.f32 %v1128_v34, %v1127_v61  ;;  %v1213_v19 = vmul.f32 %v2088_v24, %v1527_v57  ;;  %v1214_v47 = vmul.f32 %v2091_v20, %v1528_v7  ;;  %v1215_v35 = vmul.f32 %v2094_v8, %v1529_v32 }
 0x10b   :  { %v1148_v40 = vadd.f32 %v1147_v18, %v1146_v33  ;;  %v1167_v4 = vadd.f32 %v1166_v58, %v1160_v0  ;;  %v1200_v51 = vadd.f32 %v1528_v7, %v1199_v12  ;;  %v1216_v1 = vmul.f32 %v2097_v23, %v1530_v6 }
 0x10c   :  { %v1130_v44 = vrot.slane %v1129_v42, 1  ;;  %v1219_v5 = vadd.f32 %v1212_v31, %v1211_v27  ;;  %v1232_v28 = vmul.f32 %v1714_v9, %v1525_v30  ;;  %v1233_v62 = vmul.f32 %v1716_v10, %v1526_v49 }
 0x10d   :  { %v1149_v3 = vrot.slane %v1148_v40, 2  ;;  %v1168_v48 = vrot.slane %v1167_v4, 4  ;;  %v1201_v61 = vadd.f32 %v1529_v32, %v1200_v51  ;;  %v1217_v50 = vmul.f32 %v2102_v54, %v1531_v2 }
 0x10e   :  { %v1218_v24 = vmul.f32 %v2105_v37, %v1532_v53  ;;  %v2452_v20 = vadd.f32 %v1130_v44, %v1129_v42  ;;  %v1220_v33 = vadd.f32 %v1219_v5, %v1213_v19  ;;  %v1234_v0 = vmul.f32 %v1720_v13, %v1527_v57  ;;  %v1576_v57 = vld [vmem:[#allocation2] sm:$0xff]  ;;  %v1582_v5 = vld [vmem:[#allocation2 + $0x30] sm:$0xff] }
 0x10f   :  { %v1150_v8 = vadd.f32 %v1149_v3, %v1148_v40  ;;  %v1169_v34 = vadd.f32 %v1168_v48, %v1167_v4  ;;  %v1202_v23 = vadd.f32 %v1530_v6, %v1201_v61  ;;  %v1235_v36 = vmul.f32 %v1722_v14, %v1528_v7  ;;  %v1577_v40 = vld [vmem:[#allocation2 + $0x8] sm:$0xff]  ;;  %v1579_v4 = vld [vmem:[#allocation2 + $0x18] sm:$0xff] }
 0x110   :  { %v1236_v30 = vmul.f32 %v1726_v16, %v1529_v32  ;;  %v1221_v49 = vadd.f32 %v1220_v33, %v1214_v47  ;;  %v1237_v18 = vmul.f32 %v1728_v17, %v1530_v6  ;;  %v1240_v27 = vadd.f32 %v1233_v62, %v1232_v28  ;;  %v1578_v47 = vld [vmem:[#allocation2 + $0x10] sm:$0xff]  ;;  %v1581_v3 = vld [vmem:[#allocation2 + $0x28] sm:$0xff]  ;;  %v1583_v48 = vld [vmem:[#allocation2 + $0x38] sm:$0xff] }
 0x111   :  { %v1151_v45 = vrot.slane %v1150_v8, 1  ;;  %v1170_v54 = vrot.slane %v1169_v34, 2  ;;  %v1203_v31 = vadd.f32 %v1531_v2, %v1202_v23  ;;  %v1238_v37 = vmul.f32 %v1744_v25, %v1531_v2  ;;  %v1580_v2 = vld [vmem:[#allocation2 + $0x20] sm:$0xff] }
 0x112   :  { %v1239_v42 = vmul.f32 %v1746_v26, %v1532_v53  ;;  %v1222_v58 = vadd.f32 %v1221_v49, %v1215_v35  ;;  %v1241_v12 = vadd.f32 %v1240_v27, %v1234_v0  ;;  %vm1253_vm8 = vcmp.gt.f32.partialorder %v1576_v57, 1.0 }
 0x113   :  { %vm1254_vm9 = vcmp.gt.f32.partialorder %v1577_v40, 1.0  ;;  %v2460_v7 = vadd.f32 %v1151_v45, %v1150_v8  ;;  %v2462_v32 = vadd.f32 %v1170_v54, %v1169_v34  ;;  %v1204_v19 = vadd.f32 %v1532_v53, %v1203_v31 }
 0x114   :  { %vm1255_vm10 = vcmp.gt.f32.partialorder %v1578_v47, 1.0  ;;  %v1223_v6 = vadd.f32 %v1222_v58, %v1216_v1  ;;  %v1242_v44 = vadd.f32 %v1241_v12, %v1235_v36  ;;  %vm1256_vm11 = vcmp.gt.f32.partialorder %v1579_v4, 1.0 }
 0x115   :  { %2619 = vst [vmem:[#allocation36_spill] sm:$0xff] %v2460_v7  ;;  %vm1257_vm12 = vcmp.gt.f32.partialorder %v1580_v2, 1.0  ;;  %v1205_v51 = vrot.slane %v1204_v19, 4  ;;  %vm1258_vm13 = vcmp.gt.f32.partialorder %v1581_v3, 1.0  ;;  %vm1259_vm14 = vcmp.gt.f32.partialorder %v1582_v5, 1.0 }
 0x116   :  { %2620 = vst [vmem:[#allocation37_spill] sm:$0xff] %v2462_v32  ;;  %v1224_v28 = vadd.f32 %v1223_v6, %v1217_v50  ;;  %v1243_v62 = vadd.f32 %v1242_v44, %v1236_v30  ;;  %vm1260_vm15 = vcmp.gt.f32.partialorder %v1583_v48, 1.0  ;;  %v1533_v53 = vsel %vm1253_vm8, 1.0, %v2604_v59 }
 0x117   :  { %v1206_v1 = vadd.f32 %v1205_v51, %v1204_v19  ;;  %v1534_v61 = vsel %vm1254_vm9, 1.0, %v2604_v59  ;;  %v1535_v8 = vsel %vm1255_vm10, 1.0, %v2604_v59  ;;  %v1536_v33 = vsel %vm1256_vm11, 1.0, %v2604_v59 }
 0x118   :  { %v1225_v0 = vadd.f32 %v1224_v28, %v1218_v24  ;;  %v1244_v34 = vadd.f32 %v1243_v62, %v1237_v18  ;;  %v1537_v50 = vsel %vm1257_vm12, 1.0, %v2604_v59  ;;  %v1538_v23 = vsel %vm1258_vm13, 1.0, %v2604_v59 }
 0x119   :  { %v1207_v36 = vrot.slane %v1206_v1, 2  ;;  %v1539_v30 = vsel %vm1259_vm14, 1.0, %v2604_v59  ;;  %v1277_v45 = vadd.f32 %v1534_v61, %v1533_v53  ;;  %v1290_v49 = vmul.f32 %v1576_v57, %v1533_v53 }
 0x11a   :  { %v1226_v27 = vrot.slane %v1225_v0, 4  ;;  %v1245_v54 = vadd.f32 %v1244_v34, %v1238_v37  ;;  %v1540_v31 = vsel %vm1260_vm15, 1.0, %v2604_v59  ;;  %v1291_v58 = vmul.f32 %v1577_v40, %v1534_v61 }
 0x11b   :  { %v1208_v12 = vadd.f32 %v1207_v36, %v1206_v1  ;;  %v1278_v19 = vadd.f32 %v1535_v8, %v1277_v45  ;;  %v1292_v24 = vmul.f32 %v1578_v47, %v1535_v8  ;;  %v1293_v18 = vmul.f32 %v1579_v4, %v1536_v33 }
 0x11c   :  { %v1227_v6 = vadd.f32 %v1226_v27, %v1225_v0  ;;  %v1246_v44 = vadd.f32 %v1245_v54, %v1239_v42  ;;  %v1294_v51 = vmul.f32 %v1580_v2, %v1537_v50  ;;  %v1295_v28 = vmul.f32 %v1581_v3, %v1538_v23 }
 0x11d   :  { %v1209_v62 = vrot.slane %v1208_v12, 1  ;;  %v1279_v35 = vadd.f32 %v1536_v33, %v1278_v19  ;;  %v1296_v22 = vmul.f32 %v1582_v5, %v1539_v30  ;;  %v1298_v32 = vadd.f32 %v1291_v58, %v1290_v49  ;;  %v2622_v58 = vld [vmem:[#allocation11_spill] sm:$0xff] }
 0x11e   :  { %v1228_v7 = vrot.slane %v1227_v6, 2  ;;  %v1247_v57 = vrot.slane %v1246_v44, 4  ;;  %v1311_v37 = vmul.f32 %v1714_v9, %v1533_v53  ;;  %v1312_v34 = vmul.f32 %v1716_v10, %v1534_v61 }
 0x11f   :  { %v2481_v59 = vadd.f32 %v1209_v62, %v1208_v12  ;;  %v1280_v40 = vadd.f32 %v1537_v50, %v1279_v35  ;;  %v1297_v1 = vmul.f32 %v1583_v48, %v1540_v31  ;;  %v1299_v47 = vadd.f32 %v1298_v32, %v1292_v24 }
 0x120   :  { %v1229_v4 = vadd.f32 %v1228_v7, %v1227_v6  ;;  %v1248_v0 = vadd.f32 %v1247_v57, %v1246_v44  ;;  %v1313_v42 = vmul.f32 %v1720_v13, %v1535_v8  ;;  %v1314_v2 = vmul.f32 %v1722_v14, %v1536_v33  ;;  %v2624_v44 = vld [vmem:[#allocation17_spill] sm:$0xff] }
 0x121   :  { %v1281_v3 = vadd.f32 %v1538_v23, %v1280_v40  ;;  %v1300_v5 = vadd.f32 %v1299_v47, %v1293_v18  ;;  %v1315_v36 = vmul.f32 %v1726_v16, %v1537_v50  ;;  %v1316_v45 = vmul.f32 %v1728_v17, %v1538_v23  ;;  %v2623_v18 = vld [vmem:[#allocation15_spill] sm:$0xff] }
 0x122   :  { %v1230_v9 = vrot.slane %v1229_v4, 1  ;;  %v1249_v53 = vrot.slane %v1248_v0, 2  ;;  %v1317_v10 = vmul.f32 %v1744_v25, %v1539_v30  ;;  %v1319_v61 = vadd.f32 %v1312_v34, %v1311_v37  ;;  %v2627_v37 = vld [vmem:[#allocation19_spill] sm:$0xff] }
 0x123   :  { %v1282_v35 = vadd.f32 %v1539_v30, %v1281_v3  ;;  %v1301_v48 = vadd.f32 %v1300_v5, %v1294_v51  ;;  %vm1332_vm0 = vcmask 1040384   ;;  %vm1334_vm1 = vcmask 1041408   ;;  %v2626_v51 = vld [vmem:[#allocation27_spill] sm:$0xff] }
 0x124   :  { %v2488_v7 = vadd.f32 %v1249_v53, %v1248_v0  ;;  %v1318_v13 = vmul.f32 %v1746_v26, %v1540_v31  ;;  %v1320_v14 = vadd.f32 %v1319_v61, %v1313_v42  ;;  %v1333_v16 = vsel %vm1332_vm0, %v1803_v63, %v1840_v21  ;;  %v2630_v5 = vld [vmem:[#allocation23_spill] sm:$0xff]  ;;  %v2632_v53 = vld [vmem:[#allocation33_spill] sm:$0xff]  ;;  %v2634_v61 = vld [vmem:[#allocation12_spill] sm:$0xff] }
 0x125   :  { %v1283_v32 = vadd.f32 %v1540_v31, %v1282_v35  ;;  %v1302_v17 = vadd.f32 %v1301_v48, %v1295_v28  ;;  %v1335_v8 = vsel %vm1334_vm1, %v1333_v16, %v1890_v46  ;;  %vm1336_vm2 = vcmask 1042432   ;;  %v2621_v31 = vld [vmem:[#allocation13_spill] sm:$0xff] }
 0x126   :  { %v1231_v25 = vadd.f32 %v1230_v9, %v1229_v4  ;;  %v1321_v33 = vadd.f32 %v1320_v14, %v1314_v2  ;;  %v1337_v50 = vsel %vm1336_vm2, %v1335_v8, %v1942_v60  ;;  %vm1338_vm3 = vcmask 1043456   ;;  %v2629_v4 = vld [vmem:[#allocation31_spill] sm:$0xff] }
 0x127   :  { %v1284_v23 = vrot.slane %v1283_v32, 4  ;;  %v1303_v30 = vadd.f32 %v1302_v17, %v1296_v22  ;;  %v1339_v26 = vsel %vm1338_vm3, %v1337_v50, %v1993_v15  ;;  %vm1340_vm4 = vcmask 1044480   ;;  %v2636_v17 = vld [vmem:[#allocation36_spill] sm:$0xff] }
 0x128   :  { %v1251_v63 = vrot.slane %v2488_v7, 1  ;;  %v1322_v21 = vadd.f32 %v1321_v33, %v1315_v36  ;;  %v1341_v49 = vsel %vm1340_vm4, %v1339_v26, %v2040_v29  ;;  %vm1342_vm5 = vcmask 1045504   ;;  %v2637_v33 = vld [vmem:[#allocation18_spill] sm:$0xff] }
 0x129   :  { %v1285_v46 = vadd.f32 %v1284_v23, %v1283_v32  ;;  %v1304_v27 = vadd.f32 %v1303_v30, %v1297_v1  ;;  %v1343_v54 = vsel %vm1342_vm5, %v1341_v49, %v2108_v43  ;;  %vm1344_vm6 = vcmask 1046528   ;;  %v2638_v23 = vld [vmem:[#allocation30_spill] sm:$0xff]  ;;  %v2639_v30 = vld [vmem:[#allocation28_spill] sm:$0xff] }
 0x12a   :  { %v1323_v60 = vadd.f32 %v1322_v21, %v1316_v45  ;;  %v1345_v22 = vsel %vm1344_vm6, %v1343_v54, %v2156_v11  ;;  %v1346_v15 = vsel %vm1332_vm0, %v2207_v55, %v2254_v38  ;;  %v1353_v12 = vsel %vm1332_vm0, %v2622_v58, %v2621_v31  ;;  %v2625_v38 = vld [vmem:[#allocation29_spill] sm:$0xff]  ;;  %v2642_v54 = vld [vmem:[#allocation20_spill] sm:$0xff]  ;;  %v2643_v31 = vld [vmem:[#allocation22_spill] sm:$0xff] }
 0x12b   :  { %v1286_v29 = vrot.slane %v1285_v46, 2  ;;  %v1305_v19 = vrot.slane %v1304_v27, 4  ;;  %v1347_v24 = vsel %vm1334_vm1, %v1346_v15, %v2306_v41  ;;  %v1354_v43 = vsel %vm1334_vm1, %v1353_v12, %v2623_v18  ;;  %1387 = vst [vmem:[#allocation7] sm:$0xff] %v1345_v22  ;;  %v2631_v45 = vld [vmem:[#allocation25_spill] sm:$0xff]  ;;  %v2644_v12 = vld [vmem:[#allocation32_spill] sm:$0xff] }
 0x12c   :  { %v1324_v6 = vadd.f32 %v1323_v60, %v1317_v10  ;;  %v1348_v11 = vsel %vm1336_vm2, %v1347_v24, %v2354_v52  ;;  %v1355_v55 = vsel %vm1336_vm2, %v1354_v43, %v2624_v44  ;;  %v1360_v28 = vsel %vm1332_vm0, %v2626_v51, %v2625_v38  ;;  %v2628_v52 = vld [vmem:[#allocation21_spill] sm:$0xff]  ;;  %v2633_v10 = vld [vmem:[#allocation14_spill] sm:$0xff]  ;;  %v2645_v18 = vld [vmem:[#allocation24_spill] sm:$0xff] }
 0x12d   :  { %v1287_v62 = vadd.f32 %v1286_v29, %v1285_v46  ;;  %v1306_v57 = vadd.f32 %v1305_v19, %v1304_v27  ;;  %v1349_v41 = vsel %vm1338_vm3, %v1348_v11, %v2405_v39  ;;  %v1356_v34 = vsel %vm1338_vm3, %v1355_v55, %v2627_v37  ;;  %v2640_v21 = vld [vmem:[#allocation37_spill] sm:$0xff]  ;;  %v2647_v55 = vld [vmem:[#allocation26_spill] sm:$0xff]  ;;  %v2648_v38 = vld [vmem:[#allocation35_spill] sm:$0xff] }
 0x12e   :  { %v1325_v40 = vadd.f32 %v1324_v6, %v1318_v13  ;;  %v1350_v1 = vsel %vm1340_vm4, %v1349_v41, %v2452_v20  ;;  %v1357_v47 = vsel %vm1340_vm4, %v1356_v34, %v2628_v52  ;;  %v1361_v0 = vsel %vm1334_vm1, %v1360_v28, %v2629_v4  ;;  %v2646_v6 = vld [vmem:[#allocation34_spill] sm:$0xff] }
 0x12f   :  { %v1288_v42 = vrot.slane %v1287_v62, 1  ;;  %v1307_v2 = vrot.slane %v1306_v57, 2  ;;  %v1351_v3 = vsel %vm1342_vm5, %v1350_v1, %v2481_v59  ;;  %v1358_v39 = vsel %vm1342_vm5, %v1357_v47, %v2630_v5  ;;  %v2635_v59 = vld [vmem:[#allocation16_spill] sm:$0xff] }
 0x130   :  { %v1326_v36 = vrot.slane %v1325_v40, 4  ;;  %v1359_v9 = vsel %vm1344_vm6, %v1358_v39, %v2631_v45  ;;  %v1362_v20 = vsel %vm1336_vm2, %v1361_v0, %v2632_v53  ;;  %v1367_v35 = vsel %vm1332_vm0, %v2634_v61, %v2633_v10 }
 0x131   :  { %v1289_v48 = vadd.f32 %v1288_v42, %v1287_v62  ;;  %v1308_v13 = vadd.f32 %v1307_v2, %v1306_v57  ;;  %v1363_v14 = vsel %vm1338_vm3, %v1362_v20, %v2411_v56  ;;  %v1368_v16 = vsel %vm1334_vm1, %v1367_v35, %v2635_v59  ;;  %1389 = vst [vmem:[#allocation7 + $0x10] sm:$0xff] %v1359_v9 }
 0x132   :  { %v1327_v32 = vadd.f32 %v1326_v36, %v1325_v40  ;;  %v1364_v8 = vsel %vm1340_vm4, %v1363_v14, %v2636_v17  ;;  %v1369_v50 = vsel %vm1336_vm2, %v1368_v16, %v2637_v33  ;;  %v1374_v26 = vsel %vm1332_vm0, %v2639_v30, %v2638_v23 }
 0x133   :  { %v2641_v49 = vrot.slane %v2640_v21, 1  ;;  %v1309_v56 = vrot.slane %v1308_v13, 1  ;;  %v1352_v27 = vsel %vm1344_vm6, %v1351_v3, %v1289_v48  ;;  %v1370_v60 = vsel %vm1338_vm3, %v1369_v50, %v2642_v54 }
 0x134   :  { %v1328_v22 = vrot.slane %v1327_v32, 2  ;;  %v1365_v15 = vsel %vm1342_vm5, %v1364_v8, %v1231_v25  ;;  %v1371_v58 = vsel %vm1340_vm4, %v1370_v60, %v2643_v31  ;;  %v1375_v29 = vsel %vm1334_vm1, %v1374_v26, %v2644_v12  ;;  %1388 = vst [vmem:[#allocation7 + $0x8] sm:$0xff] %v1352_v27 }
 0x135   :  { %v1173_v46 = vadd.f32 %v2641_v49, %v2640_v21  ;;  %v1252_v19 = vadd.f32 %v1251_v63, %v2488_v7  ;;  %v1310_v24 = vadd.f32 %v1309_v56, %v1308_v13  ;;  %v1372_v43 = vsel %vm1342_vm5, %v1371_v58, %v2645_v18 }
 0x136   :  { %v1376_v11 = vsel %vm1336_vm2, %v1375_v29, %v2646_v6  ;;  %v1329_v44 = vadd.f32 %v1328_v22, %v1327_v32  ;;  %v1373_v25 = vsel %vm1344_vm6, %v1372_v43, %v2647_v55 }
 0x137   :  { %v1377_v51 = vsel %vm1338_vm3, %v1376_v11, %v2648_v38  ;;  %v1366_v28 = vsel %vm1344_vm6, %v1365_v15, %v1310_v24  ;;  %1391 = vst [vmem:[#allocation7 + $0x20] sm:$0xff] %v1373_v25 }
 0x138   :  { %v1378_v62 = vsel %vm1340_vm4, %v1377_v51, %v1173_v46  ;;  %v1330_v7 = vrot.slane %v1329_v44, 1  ;;  %1390 = vst [vmem:[#allocation7 + $0x18] sm:$0xff] %v1366_v28 }
 0x139   :  { %v1379_v63 = vsel %vm1342_vm5, %v1378_v62, %v1252_v19 }
 0x13a   :  { %v1331_v57 = vadd.f32 %v1330_v7, %v1329_v44 }
 0x13c   :  { %v1380_v41 = vsel %vm1344_vm6, %v1379_v63, %v1331_v57 }
 0x13d   :  { %1392 = vst [vmem:[#allocation7 + $0x28] sm:$0xff] %v1380_v41 }
 0x13e   :  { %1405 = dma.vmem_to_hbm [thread:$0]  %s1398_s22, 768, %s1400_s25, [#allocation4], %s1663_s17, %s1663_s17, %s1664_s18  }
 0x13f   :  { %1660 = dma.done.wait [#allocation4], 768  }
 0x140   :  { %1661 = vsyncadd [#allocation4], 4294966528 }
 0x141   :  { %1410 = vsyncpa [#allocation3], 1 }
 0x142   :  { %1411 = vsyncpa [#allocation6], 1 }
 0x143   :  { %1412 = vsyncpa [#allocation4], 1 }

</bundles_post_ra>
